<compile_context>
chip_gen: v7x
topology: tpu7x:2x2x1
jax: 0.10.0
libtpu: 0.0.40
codegen_flags: <defaults>
</compile_context>

<pallas_src>
import math

import jax
import jax.numpy as jnp
from jax.experimental import pallas as pl
from jax.experimental.pallas import tpu as pltpu


MATMUL_DTYPE = jnp.bfloat16   # MXU operand dtype; accumulation is always f32.


# ----------------------------------------------------------------------------- helpers
def _layernorm(x, gamma, beta, eps=1e-5):
    mu = jnp.mean(x, axis=-1, keepdims=True)
    var = jnp.mean((x - mu) ** 2, axis=-1, keepdims=True)
    return (x - mu) * jax.lax.rsqrt(var + eps) * gamma + beta


# -------------------------------------------------------------- fused encoder kernel
def make_encoder_kernel(S, P, D, H, F):
    hd = D // H
    inv_scale = 1.0 / math.sqrt(float(hd))

    def kernel(x_ref, cos_ref, sa_ref, sb_ref, pad_ref,
               embw_ref, embb_ref,
               wq_ref, bq_ref, wk_ref, bk_ref, wv_ref, bv_ref,
               wo_ref, bo_ref, w1_ref, b1_ref, w2_ref, b2_ref,
               g_ref, be_ref, o_ref):
        l = pl.program_id(1)
        bf = MATMUL_DTYPE

        # ---------- layer 0 only: patch embedding + RoPE, written into the
        # VMEM-resident output block, which doubles as the residual-stream buffer.
        @pl.when(l == 0)
        def _():
            xp = x_ref[0].astype(bf)                                        # (S, P)
            y = jnp.dot(xp, embw_ref[...],
                        preferred_element_type=jnp.float32) + embb_ref[...]  # (S, D) f32
            # RoPE without a DxD rotation matmul:
            #   out = y * cos + y[j+1] * sinA + y[j-1] * sinB
            # sinA = -sin on even lanes / 0 on odd, sinB = 0 / +sin (precomputed per head,
            # broadcast across heads here by lane-concatenation).
            cos = jnp.concatenate([cos_ref[0]] * H, axis=-1)                 # (S, D)
            sa = jnp.concatenate([sa_ref[0]] * H, axis=-1)
            sb = jnp.concatenate([sb_ref[0]] * H, axis=-1)
            y_next = jnp.concatenate([y[:, 1:], y[:, :1]], axis=-1)          # y[j+1] (wrap)
            y_prev = jnp.concatenate([y[:, -1:], y[:, :-1]], axis=-1)        # y[j-1] (wrap)
            o_ref[0] = y * cos + y_next * sa + y_prev * sb

        # ---------- one encoder layer (every l) --------------------------------
        x = o_ref[0]                                                         # (S, D) f32
        key_pad = pad_ref[0]                                                 # (1, S) int32
        xb = x.astype(bf)

        q = jnp.dot(xb, wq_ref[0], preferred_element_type=jnp.float32) + bq_ref[0]
        k = jnp.dot(xb, wk_ref[0], preferred_element_type=jnp.float32) + bk_ref[0]
        v = jnp.dot(xb, wv_ref[0], preferred_element_type=jnp.float32) + bv_ref[0]
        q = q * inv_scale                      # fold 1/sqrt(head_dim) into q

        # split heads -> (H, S, hd); layout-only (slices + concat), no per-head matmuls.
        def heads(t):
            return jnp.concatenate(
                [t[None, :, h * hd:(h + 1) * hd] for h in range(H)], axis=0)

        qh, kh, vh = heads(q), heads(k), heads(v)

        logits = jnp.einsum("hqd,hkd->hqk", qh.astype(bf), kh.astype(bf),
                            preferred_element_type=jnp.float32)              # (H, S, S)
        logits = jnp.where(key_pad > 0, float("-inf"), logits)               # mask padded keys
        m = jnp.max(logits, axis=-1, keepdims=True)
        e = jnp.exp(logits - m)
        a = e * pl.reciprocal(jnp.sum(e, axis=-1, keepdims=True), approx=True)

        ctx = jnp.einsum("hqk,hkd->hqd", a.astype(bf), vh.astype(bf),
                         preferred_element_type=jnp.float32)                 # (H, S, hd)
        ctx = jnp.concatenate([ctx[h] for h in range(H)], axis=-1)           # (S, D)

        attn = jnp.dot(ctx.astype(bf), wo_ref[0],
                       preferred_element_type=jnp.float32) + bo_ref[0]       # ONE out-proj

        gamma = g_ref[0]
        beta = be_ref[0]
        x1 = _layernorm(attn + x, gamma, beta)          # module shares one LayerNorm/layer

        h1 = jnp.maximum(
            jnp.dot(x1.astype(bf), w1_ref[0],
                    preferred_element_type=jnp.float32) + b1_ref[0], 0.0)
        ff = jnp.dot(h1.astype(bf), w2_ref[0],
                     preferred_element_type=jnp.float32) + b2_ref[0]
        o_ref[0] = _layernorm(ff + x1, gamma, beta)

    return kernel


# ------------------------------------------------------------------------ full model
def image_encoder_forward(x, lengths, params, num_heads):
    B, S, P = x.shape
    D = params["emb_w"].shape[1]
    L = len(params["layers"])
    H = num_heads
    hd = D // H
    F = params["layers"][0]["w1"].shape[1]
    f32 = jnp.float32

    # RoPE tables, only (B, S, hd) each (broadcast across heads inside the kernel).
    positions = (jnp.arange(S, dtype=jnp.int32)[None, :]
                 - (lengths // 2)[:, None]).astype(f32)                        # (B, S)
    freqs = 1.0 / (10000.0 ** (jnp.arange(0, hd, 2, dtype=f32) / hd))          # (hd//2,)
    ang = positions[:, :, None] * freqs[None, None, :]                         # (B, S, hd//2)
    cos = jnp.cos(ang)
    sin = jnp.sin(ang)
    zeros = jnp.zeros_like(sin)
    cos_t = jnp.repeat(cos, 2, axis=-1)                                        # (B, S, hd)
    sin_a = jnp.stack([-sin, zeros], axis=-1).reshape(B, S, hd)                # even: -sin
    sin_b = jnp.stack([zeros, sin], axis=-1).reshape(B, S, hd)                 # odd:  +sin

    key_pad = (jnp.arange(S, dtype=jnp.int32)[None, :]
               >= lengths[:, None]).astype(jnp.int32)                          # (B, S)
    key_pad3 = key_pad[:, None, :]                                             # (B, 1, S)

    # Stack per-layer params along a leading layer axis; feed weight matrices as bf16.
    def stk(name, dtype):
        return jnp.stack([lp[name] for lp in params["layers"]]).astype(dtype)

    emb_w = params["emb_w"].astype(MATMUL_DTYPE)
    emb_b = params["emb_b"]
    wq, wk, wv, wo = (stk(n, MATMUL_DTYPE) for n in ("wq", "wk", "wv", "wo"))
    w1, w2 = stk("w1", MATMUL_DTYPE), stk("w2", MATMUL_DTYPE)
    bq, bk, bv, bo = (stk(n, f32) for n in ("bq", "bk", "bv", "bo"))
    b1, b2 = stk("b1", f32), stk("b2", f32)
    gamma, beta = stk("gamma", f32), stk("beta", f32)

    kernel = make_encoder_kernel(S, P, D, H, F)

    def batch_spec(shape):
        n = len(shape)
        return pl.BlockSpec((1,) + tuple(shape[1:]), lambda b, l: (b,) + (0,) * (n - 1))

    def const_spec(shape):
        n = len(shape)
        return pl.BlockSpec(tuple(shape), lambda b, l: (0,) * n)

    def layer_spec(shape):
        n = len(shape)
        return pl.BlockSpec((1,) + tuple(shape[1:]), lambda b, l: (l,) + (0,) * (n - 1))

    in_specs = [
        batch_spec(x.shape), batch_spec(cos_t.shape),
        batch_spec(sin_a.shape), batch_spec(sin_b.shape),
        batch_spec(key_pad3.shape),
        const_spec(emb_w.shape), const_spec(emb_b.shape),
        layer_spec(wq.shape), layer_spec(bq.shape),
        layer_spec(wk.shape), layer_spec(bk.shape),
        layer_spec(wv.shape), layer_spec(bv.shape),
        layer_spec(wo.shape), layer_spec(bo.shape),
        layer_spec(w1.shape), layer_spec(b1.shape),
        layer_spec(w2.shape), layer_spec(b2.shape),
        layer_spec(gamma.shape), layer_spec(beta.shape),
    ]

    y = pl.pallas_call(
        kernel,
        out_shape=jax.ShapeDtypeStruct((B, S, D), f32),
        grid=(B, L),                       # layer axis last (reduction-like, "arbitrary")
        in_specs=in_specs,
        out_specs=pl.BlockSpec((1, S, D), lambda b, l: (b, 0, 0)),   # VMEM-resident over l
        compiler_params=pltpu.CompilerParams(
            dimension_semantics=("parallel", "arbitrary"),
            vmem_limit_bytes=48 * 1024 * 1024),
    )(x, cos_t, sin_a, sin_b, key_pad3,
      emb_w, emb_b, wq, bq, wk, bk, wv, bv, wo, bo, w1, b1, w2, b2, gamma, beta)

    pad_mask = key_pad[:, None, None, :].astype(bool)                # (B, 1, 1, S), as in torch
    return y, pad_mask


# -------------------------------------------- pure-JAX reference, same mixed precision
def reference_mixed(x, lengths, params, num_heads):
    """Mirrors the kernel's precision exactly: bf16 MXU operands, f32 accumulation,
    f32 softmax / LayerNorm."""
    B, S, _ = x.shape
    D = params["emb_w"].shape[1]
    H = num_heads
    hd = D // H
    bf = MATMUL_DTYPE
    f32 = jnp.float32

    def mm(a, b):
        return jnp.einsum("...ij,jk->...ik", a.astype(bf), b.astype(bf),
                          preferred_element_type=f32)

    y = mm(x, params["emb_w"]) + params["emb_b"]

    positions = (jnp.arange(S)[None, :] - (lengths // 2)[:, None]).astype(f32)
    freqs = 1.0 / (10000.0 ** (jnp.arange(0, hd, 2, dtype=f32) / hd))
    ang = positions[:, :, None] * freqs
    cosr = jnp.cos(ang)[:, :, None, :]
    sinr = jnp.sin(ang)[:, :, None, :]
    yr = y.reshape(B, S, H, hd // 2, 2)
    y0, y1 = yr[..., 0], yr[..., 1]
    y = jnp.stack([y0 * cosr - y1 * sinr, y1 * cosr + y0 * sinr], axis=-1).reshape(B, S, D)

    pad = jnp.arange(S)[None, :] >= lengths[:, None]
    inv_scale = 1.0 / math.sqrt(hd)

    def ln(z, g, b):
        mu = z.mean(-1, keepdims=True)
        var = ((z - mu) ** 2).mean(-1, keepdims=True)
        return (z - mu) * jax.lax.rsqrt(var + 1e-5) * g + b

    for lp in params["layers"]:
        q = (mm(y, lp["wq"]) + lp["bq"]) * inv_scale
        k = mm(y, lp["wk"]) + lp["bk"]
        v = mm(y, lp["wv"]) + lp["bv"]
        q = q.reshape(B, S, H, hd).transpose(0, 2, 1, 3)
        k = k.reshape(B, S, H, hd).transpose(0, 2, 1, 3)
        v = v.reshape(B, S, H, hd).transpose(0, 2, 1, 3)
        logits = jnp.einsum("bhqd,bhkd->bhqk", q.astype(bf), k.astype(bf),
                            preferred_element_type=f32)
        logits = jnp.where(pad[:, None, None, :], float("-inf"), logits)
        a = jax.nn.softmax(logits, axis=-1)
        o = jnp.einsum("bhqk,bhkd->bhqd", a.astype(bf), v.astype(bf),
                       preferred_element_type=f32)
        o = o.transpose(0, 2, 1, 3).reshape(B, S, D)
        o = mm(o, lp["wo"]) + lp["bo"]
        y = ln(o + y, lp["gamma"], lp["beta"])
        h1 = jnp.maximum(mm(y, lp["w1"]) + lp["b1"], 0.0)
        f = mm(h1, lp["w2"]) + lp["b2"]
        y = ln(f + y, lp["gamma"], lp["beta"])
    return y


# ---------------------------------------------------- pure-f32 (module-semantics) ref
def reference_f32(x, lengths, params, num_heads):
    B, S, _ = x.shape
    D = params["emb_w"].shape[1]
    H = num_heads
    hd = D // H

    y = x @ params["emb_w"] + params["emb_b"]
    positions = (jnp.arange(S)[None, :] - (lengths // 2)[:, None]).astype(jnp.float32)
    freqs = 1.0 / (10000.0 ** (jnp.arange(0, hd, 2, dtype=jnp.float32) / hd))
    ang = positions[:, :, None] * freqs
    cosr = jnp.cos(ang)[:, :, None, :]
    sinr = jnp.sin(ang)[:, :, None, :]
    yr = y.reshape(B, S, H, hd // 2, 2)
    y0, y1 = yr[..., 0], yr[..., 1]
    y = jnp.stack([y0 * cosr - y1 * sinr, y1 * cosr + y0 * sinr], axis=-1).reshape(B, S, D)

    pad = jnp.arange(S)[None, :] >= lengths[:, None]

    def ln(z, g, b):
        mu = z.mean(-1, keepdims=True)
        var = ((z - mu) ** 2).mean(-1, keepdims=True)
        return (z - mu) / jnp.sqrt(var + 1e-5) * g + b

    for lp in params["layers"]:
        q = (y @ lp["wq"] + lp["bq"]).reshape(B, S, H, hd).transpose(0, 2, 1, 3)
        k = (y @ lp["wk"] + lp["bk"]).reshape(B, S, H, hd).transpose(0, 2, 1, 3)
        v = (y @ lp["wv"] + lp["bv"]).reshape(B, S, H, hd).transpose(0, 2, 1, 3)
        logits = jnp.einsum("bhqd,bhkd->bhqk", q, k) / math.sqrt(hd)
        logits = jnp.where(pad[:, None, None, :], float("-inf"), logits)
        a = jax.nn.softmax(logits, axis=-1)
        o = jnp.einsum("bhqk,bhkd->bhqd", a, v).transpose(0, 2, 1, 3).reshape(B, S, D)
        o = o @ lp["wo"] + lp["bo"]
        y = ln(o + y, lp["gamma"], lp["beta"])
        f = jnp.maximum(y @ lp["w1"] + lp["b1"], 0.0) @ lp["w2"] + lp["b2"]
        y = ln(f + y, lp["gamma"], lp["beta"])
    return y


# --------------------------------------------------------------------------- params
def init_params(key, patch_len, embed_dim, num_heads, num_layers):
    ff_dim = 4 * embed_dim

    def linear(k, fan_in, fan_out):
        k1, k2 = jax.random.split(k)
        w = jax.random.normal(k1, (fan_in, fan_out), jnp.float32) * 0.05
        b = jax.random.normal(k2, (1, fan_out), jnp.float32) * 0.05
        return w, b

    keys = jax.random.split(key, 1 + num_layers)
    emb_w, emb_b = linear(keys[0], patch_len, embed_dim)
    layers = []
    for li in range(num_layers):
        lk = jax.random.split(keys[1 + li], 6)
        wq, bq = linear(lk[0], embed_dim, embed_dim)
        wk, bk = linear(lk[1], embed_dim, embed_dim)
        wv, bv = linear(lk[2], embed_dim, embed_dim)
        wo, bo = linear(lk[3], embed_dim, embed_dim)
        w1, b1 = linear(lk[4], embed_dim, ff_dim)
        w2, b2 = linear(lk[5], ff_dim, embed_dim)
        layers.append(dict(
            wq=wq, bq=bq, wk=wk, bk=bk, wv=wv, bv=bv, wo=wo, bo=bo,
            w1=w1, b1=b1, w2=w2, b2=b2,
            # The PyTorch module defines a single self.norm per layer and applies it to
            # both the attention and FFN residuals -> one (gamma, beta) pair per layer.
            gamma=jnp.ones((1, embed_dim), jnp.float32),
            beta=jnp.zeros((1, embed_dim), jnp.float32),
        ))
    return dict(emb_w=emb_w, emb_b=emb_b, layers=layers)


# ----------------------------------------------------------------------------- main
if __name__ == "__main__":
    B, S, PATCH_LEN = 2, 8, 16
    EMBED_DIM, NUM_HEADS, NUM_LAYERS = 32, 4, 2

    root = jax.random.PRNGKey(0)
    kx, kp = jax.random.split(root)
    x = jax.random.normal(kx, (B, S, PATCH_LEN), jnp.float32)
    lengths = jnp.array([5, 8], dtype=jnp.int32)   # lengths == 0 would NaN, as in PyTorch
    params = init_params(kp, PATCH_LEN, EMBED_DIM, NUM_HEADS, NUM_LAYERS)

    y, pad_mask = image_encoder_forward(x, lengths, params, NUM_HEADS)
    jax.block_until_ready(y)

    y_mixed = reference_mixed(x, lengths, params, NUM_HEADS)
    y_f32 = reference_f32(x, lengths, params, NUM_HEADS)

    assert y.shape == (B, S, EMBED_DIM)
    assert pad_mask.shape == (B, 1, 1, S)
    # Tight check vs a pure-JAX reference with identical mixed precision (bf16 MXU feed).
    assert jnp.allclose(y, y_mixed, atol=5e-3, rtol=5e-3), \
        "Pallas output mismatch vs mixed-precision reference"
    # Looser check vs full-f32 module semantics; the gap is the deliberate bf16 MXU feed.
    assert jnp.allclose(y, y_f32, atol=5e-2, rtol=5e-2), \
        "Pallas output mismatch vs f32 reference"

    print("KERNEL_OK")
</pallas_src>

<mosaic_0001>
module attributes {stable_mosaic.version = 11 : i64} {
  func.func @kernel(%arg0: i32, %arg1: i32, %arg2: memref<1x8x16xf32, #tpu.memory_space<vmem>>, %arg3: memref<1x8x8xf32, #tpu.memory_space<vmem>>, %arg4: memref<1x8x8xf32, #tpu.memory_space<vmem>>, %arg5: memref<1x8x8xf32, #tpu.memory_space<vmem>>, %arg6: memref<1x1x8xi32, #tpu.memory_space<vmem>>, %arg7: memref<16x32xbf16, #tpu.memory_space<vmem>>, %arg8: memref<1x32xf32, #tpu.memory_space<vmem>>, %arg9: memref<1x32x32xbf16, #tpu.memory_space<vmem>>, %arg10: memref<1x1x32xf32, #tpu.memory_space<vmem>>, %arg11: memref<1x32x32xbf16, #tpu.memory_space<vmem>>, %arg12: memref<1x1x32xf32, #tpu.memory_space<vmem>>, %arg13: memref<1x32x32xbf16, #tpu.memory_space<vmem>>, %arg14: memref<1x1x32xf32, #tpu.memory_space<vmem>>, %arg15: memref<1x32x32xbf16, #tpu.memory_space<vmem>>, %arg16: memref<1x1x32xf32, #tpu.memory_space<vmem>>, %arg17: memref<1x32x128xbf16, #tpu.memory_space<vmem>>, %arg18: memref<1x1x128xf32, #tpu.memory_space<vmem>>, %arg19: memref<1x128x32xbf16, #tpu.memory_space<vmem>>, %arg20: memref<1x1x32xf32, #tpu.memory_space<vmem>>, %arg21: memref<1x1x32xf32, #tpu.memory_space<vmem>>, %arg22: memref<1x1x32xf32, #tpu.memory_space<vmem>>, %arg23: memref<1x8x32xf32, #tpu.memory_space<vmem>>) attributes {dimension_semantics = [#tpu.dimension_semantics<parallel>, #tpu.dimension_semantics<arbitrary>], iteration_bounds = array<i64: 2, 2>, scalar_prefetch = 0 : i64, scratch_operands = 0 : i64, tpu.core_type = #tpu.core_type<tc>, window_params = [{transform_indices = @transform_0, window_bounds = array<i64: 1, 8, 16>}, {transform_indices = @transform_1, window_bounds = array<i64: 1, 8, 8>}, {transform_indices = @transform_2, window_bounds = array<i64: 1, 8, 8>}, {transform_indices = @transform_3, window_bounds = array<i64: 1, 8, 8>}, {transform_indices = @transform_4, window_bounds = array<i64: 1, 1, 8>}, {pipeline_mode = #tpu.pipeline_mode<synchronous>, transform_indices = @transform_5, window_bounds = array<i64: 16, 32>}, {pipeline_mode = #tpu.pipeline_mode<synchronous>, transform_indices = @transform_6, window_bounds = array<i64: 1, 32>}, {transform_indices = @transform_7, window_bounds = array<i64: 1, 32, 32>}, {transform_indices = @transform_8, window_bounds = array<i64: 1, 1, 32>}, {transform_indices = @transform_9, window_bounds = array<i64: 1, 32, 32>}, {transform_indices = @transform_10, window_bounds = array<i64: 1, 1, 32>}, {transform_indices = @transform_11, window_bounds = array<i64: 1, 32, 32>}, {transform_indices = @transform_12, window_bounds = array<i64: 1, 1, 32>}, {transform_indices = @transform_13, window_bounds = array<i64: 1, 32, 32>}, {transform_indices = @transform_14, window_bounds = array<i64: 1, 1, 32>}, {transform_indices = @transform_15, window_bounds = array<i64: 1, 32, 128>}, {transform_indices = @transform_16, window_bounds = array<i64: 1, 1, 128>}, {transform_indices = @transform_17, window_bounds = array<i64: 1, 128, 32>}, {transform_indices = @transform_18, window_bounds = array<i64: 1, 1, 32>}, {transform_indices = @transform_19, window_bounds = array<i64: 1, 1, 32>}, {transform_indices = @transform_20, window_bounds = array<i64: 1, 1, 32>}, {transform_indices = @transform_21, window_bounds = array<i64: 1, 8, 32>}]} {
    %c0_i32 = arith.constant 0 : i32
    %0 = arith.cmpi eq, %arg1, %c0_i32 : i32
    %1 = arith.extui %0 : i1 to i32
    %c0_i32_0 = arith.constant 0 : i32
    %2 = arith.cmpi ne, %1, %c0_i32_0 : i32
    scf.if %2 {
      %c0_74 = arith.constant 0 : index
      %c0_75 = arith.constant 0 : index
      %c0_76 = arith.constant 0 : index
      %168 = vector.load %arg2[%c0_74, %c0_75, %c0_76] : memref<1x8x16xf32, #tpu.memory_space<vmem>>, vector<1x8x16xf32>
      %169 = vector.shape_cast %168 : vector<1x8x16xf32> to vector<8x16xf32>
      %170 = arith.truncf %169 : vector<8x16xf32> to vector<8x16xbf16>
      %c0_77 = arith.constant 0 : index
      %c0_78 = arith.constant 0 : index
      %171 = vector.load %arg7[%c0_77, %c0_78] : memref<16x32xbf16, #tpu.memory_space<vmem>>, vector<16x32xbf16>
      %cst_79 = arith.constant dense<0.000000e+00> : vector<8x32xf32>
      %172 = tpu.matmul %170, %171, %cst_79 {dimension_numbers = #tpu.dot_dimension_numbers<[1], [0], [0], [1], [0, 0, 1, 1], [], []>} : vector<8x16xbf16>, vector<16x32xbf16>, vector<8x32xf32> -> vector<8x32xf32>
      %c0_80 = arith.constant 0 : index
      %c0_81 = arith.constant 0 : index
      %173 = vector.load %arg8[%c0_80, %c0_81] : memref<1x32xf32, #tpu.memory_space<vmem>>, vector<1x32xf32>
      %174 = vector.broadcast %173 : vector<1x32xf32> to vector<8x32xf32>
      %175 = arith.addf %172, %174 : vector<8x32xf32>
      %c0_82 = arith.constant 0 : index
      %c0_83 = arith.constant 0 : index
      %c0_84 = arith.constant 0 : index
      %176 = vector.load %arg3[%c0_82, %c0_83, %c0_84] : memref<1x8x8xf32, #tpu.memory_space<vmem>>, vector<1x8x8xf32>
      %177 = vector.shape_cast %176 : vector<1x8x8xf32> to vector<8x8xf32>
      %178 = tpu.concatenate %177, %177, %177, %177 in 1 : vector<8x8xf32>, vector<8x8xf32>, vector<8x8xf32>, vector<8x8xf32> -> vector<8x32xf32>
      %c0_85 = arith.constant 0 : index
      %c0_86 = arith.constant 0 : index
      %c0_87 = arith.constant 0 : index
      %179 = vector.load %arg4[%c0_85, %c0_86, %c0_87] : memref<1x8x8xf32, #tpu.memory_space<vmem>>, vector<1x8x8xf32>
      %180 = vector.shape_cast %179 : vector<1x8x8xf32> to vector<8x8xf32>
      %181 = tpu.concatenate %180, %180, %180, %180 in 1 : vector<8x8xf32>, vector<8x8xf32>, vector<8x8xf32>, vector<8x8xf32> -> vector<8x32xf32>
      %c0_88 = arith.constant 0 : index
      %c0_89 = arith.constant 0 : index
      %c0_90 = arith.constant 0 : index
      %182 = vector.load %arg5[%c0_88, %c0_89, %c0_90] : memref<1x8x8xf32, #tpu.memory_space<vmem>>, vector<1x8x8xf32>
      %183 = vector.shape_cast %182 : vector<1x8x8xf32> to vector<8x8xf32>
      %184 = tpu.concatenate %183, %183, %183, %183 in 1 : vector<8x8xf32>, vector<8x8xf32>, vector<8x8xf32>, vector<8x8xf32> -> vector<8x32xf32>
      %185 = vector.extract_strided_slice %175 {offsets = [0, 1], sizes = [8, 31], strides = [1, 1]} : vector<8x32xf32> to vector<8x31xf32>
      %186 = vector.extract_strided_slice %175 {offsets = [0, 0], sizes = [8, 1], strides = [1, 1]} : vector<8x32xf32> to vector<8x1xf32>
      %187 = tpu.concatenate %185, %186 in 1 : vector<8x31xf32>, vector<8x1xf32> -> vector<8x32xf32>
      %188 = vector.extract_strided_slice %175 {offsets = [0, 31], sizes = [8, 1], strides = [1, 1]} : vector<8x32xf32> to vector<8x1xf32>
      %189 = vector.extract_strided_slice %175 {offsets = [0, 0], sizes = [8, 31], strides = [1, 1]} : vector<8x32xf32> to vector<8x31xf32>
      %190 = tpu.concatenate %188, %189 in 1 : vector<8x1xf32>, vector<8x31xf32> -> vector<8x32xf32>
      %191 = arith.mulf %175, %178 : vector<8x32xf32>
      %192 = arith.mulf %187, %181 : vector<8x32xf32>
      %193 = arith.addf %191, %192 : vector<8x32xf32>
      %194 = arith.mulf %190, %184 : vector<8x32xf32>
      %195 = arith.addf %193, %194 : vector<8x32xf32>
      %c0_91 = arith.constant 0 : index
      %c0_92 = arith.constant 0 : index
      %c0_93 = arith.constant 0 : index
      %196 = vector.load %arg23[%c0_91, %c0_92, %c0_93] : memref<1x8x32xf32, #tpu.memory_space<vmem>>, vector<1x8x32xf32>
      %197 = vector.shape_cast %196 : vector<1x8x32xf32> to vector<8x32xf32>
      %198 = vector.shape_cast %195 : vector<8x32xf32> to vector<1x8x32xf32>
      tpu.vector_store %arg23[%c0_91, %c0_92, %c0_93], %198 {strides = array<i32>} : memref<1x8x32xf32, #tpu.memory_space<vmem>>, vector<1x8x32xf32>,
    } else {
    }
    %c0 = arith.constant 0 : index
    %c0_1 = arith.constant 0 : index
    %c0_2 = arith.constant 0 : index
    %3 = vector.load %arg23[%c0, %c0_1, %c0_2] : memref<1x8x32xf32, #tpu.memory_space<vmem>>, vector<1x8x32xf32>
    %4 = vector.shape_cast %3 : vector<1x8x32xf32> to vector<8x32xf32>
    %c0_3 = arith.constant 0 : index
    %c0_4 = arith.constant 0 : index
    %c0_5 = arith.constant 0 : index
    %5 = vector.load %arg6[%c0_3, %c0_4, %c0_5] : memref<1x1x8xi32, #tpu.memory_space<vmem>>, vector<1x1x8xi32>
    %6 = vector.shape_cast %5 : vector<1x1x8xi32> to vector<1x8xi32>
    %7 = arith.truncf %4 : vector<8x32xf32> to vector<8x32xbf16>
    %c0_6 = arith.constant 0 : index
    %c0_7 = arith.constant 0 : index
    %c0_8 = arith.constant 0 : index
    %8 = vector.load %arg9[%c0_6, %c0_7, %c0_8] : memref<1x32x32xbf16, #tpu.memory_space<vmem>>, vector<1x32x32xbf16>
    %9 = vector.shape_cast %8 : vector<1x32x32xbf16> to vector<32x32xbf16>
    %cst = arith.constant dense<0.000000e+00> : vector<8x32xf32>
    %10 = tpu.matmul %7, %9, %cst {dimension_numbers = #tpu.dot_dimension_numbers<[1], [0], [0], [1], [0, 0, 1, 1], [], []>} : vector<8x32xbf16>, vector<32x32xbf16>, vector<8x32xf32> -> vector<8x32xf32>
    %c0_9 = arith.constant 0 : index
    %c0_10 = arith.constant 0 : index
    %c0_11 = arith.constant 0 : index
    %11 = vector.load %arg10[%c0_9, %c0_10, %c0_11] : memref<1x1x32xf32, #tpu.memory_space<vmem>>, vector<1x1x32xf32>
    %12 = vector.shape_cast %11 : vector<1x1x32xf32> to vector<1x32xf32>
    %13 = vector.broadcast %12 : vector<1x32xf32> to vector<8x32xf32>
    %14 = arith.addf %10, %13 : vector<8x32xf32>
    %c0_12 = arith.constant 0 : index
    %c0_13 = arith.constant 0 : index
    %c0_14 = arith.constant 0 : index
    %15 = vector.load %arg11[%c0_12, %c0_13, %c0_14] : memref<1x32x32xbf16, #tpu.memory_space<vmem>>, vector<1x32x32xbf16>
    %16 = vector.shape_cast %15 : vector<1x32x32xbf16> to vector<32x32xbf16>
    %cst_15 = arith.constant dense<0.000000e+00> : vector<8x32xf32>
    %17 = tpu.matmul %7, %16, %cst_15 {dimension_numbers = #tpu.dot_dimension_numbers<[1], [0], [0], [1], [0, 0, 1, 1], [], []>} : vector<8x32xbf16>, vector<32x32xbf16>, vector<8x32xf32> -> vector<8x32xf32>
    %c0_16 = arith.constant 0 : index
    %c0_17 = arith.constant 0 : index
    %c0_18 = arith.constant 0 : index
    %18 = vector.load %arg12[%c0_16, %c0_17, %c0_18] : memref<1x1x32xf32, #tpu.memory_space<vmem>>, vector<1x1x32xf32>
    %19 = vector.shape_cast %18 : vector<1x1x32xf32> to vector<1x32xf32>
    %20 = vector.broadcast %19 : vector<1x32xf32> to vector<8x32xf32>
    %21 = arith.addf %17, %20 : vector<8x32xf32>
    %c0_19 = arith.constant 0 : index
    %c0_20 = arith.constant 0 : index
    %c0_21 = arith.constant 0 : index
    %22 = vector.load %arg13[%c0_19, %c0_20, %c0_21] : memref<1x32x32xbf16, #tpu.memory_space<vmem>>, vector<1x32x32xbf16>
    %23 = vector.shape_cast %22 : vector<1x32x32xbf16> to vector<32x32xbf16>
    %cst_22 = arith.constant dense<0.000000e+00> : vector<8x32xf32>
    %24 = tpu.matmul %7, %23, %cst_22 {dimension_numbers = #tpu.dot_dimension_numbers<[1], [0], [0], [1], [0, 0, 1, 1], [], []>} : vector<8x32xbf16>, vector<32x32xbf16>, vector<8x32xf32> -> vector<8x32xf32>
    %c0_23 = arith.constant 0 : index
    %c0_24 = arith.constant 0 : index
    %c0_25 = arith.constant 0 : index
    %25 = vector.load %arg14[%c0_23, %c0_24, %c0_25] : memref<1x1x32xf32, #tpu.memory_space<vmem>>, vector<1x1x32xf32>
    %26 = vector.shape_cast %25 : vector<1x1x32xf32> to vector<1x32xf32>
    %27 = vector.broadcast %26 : vector<1x32xf32> to vector<8x32xf32>
    %28 = arith.addf %24, %27 : vector<8x32xf32>
    %cst_26 = arith.constant 0.353553385 : f32
    %29 = vector.broadcast %cst_26 : f32 to vector<8x32xf32>
    %30 = arith.mulf %14, %29 : vector<8x32xf32>
    %31 = vector.extract_strided_slice %30 {offsets = [0, 0], sizes = [8, 8], strides = [1, 1]} : vector<8x32xf32> to vector<8x8xf32>
    %32 = vector.shape_cast %31 : vector<8x8xf32> to vector<1x8x8xf32>
    %33 = vector.extract_strided_slice %30 {offsets = [0, 8], sizes = [8, 8], strides = [1, 1]} : vector<8x32xf32> to vector<8x8xf32>
    %34 = vector.shape_cast %33 : vector<8x8xf32> to vector<1x8x8xf32>
    %35 = vector.extract_strided_slice %30 {offsets = [0, 16], sizes = [8, 8], strides = [1, 1]} : vector<8x32xf32> to vector<8x8xf32>
    %36 = vector.shape_cast %35 : vector<8x8xf32> to vector<1x8x8xf32>
    %37 = vector.extract_strided_slice %30 {offsets = [0, 24], sizes = [8, 8], strides = [1, 1]} : vector<8x32xf32> to vector<8x8xf32>
    %38 = vector.shape_cast %37 : vector<8x8xf32> to vector<1x8x8xf32>
    %39 = tpu.concatenate %32, %34, %36, %38 in 0 : vector<1x8x8xf32>, vector<1x8x8xf32>, vector<1x8x8xf32>, vector<1x8x8xf32> -> vector<4x8x8xf32>
    %40 = vector.extract_strided_slice %21 {offsets = [0, 0], sizes = [8, 8], strides = [1, 1]} : vector<8x32xf32> to vector<8x8xf32>
    %41 = vector.shape_cast %40 : vector<8x8xf32> to vector<1x8x8xf32>
    %42 = vector.extract_strided_slice %21 {offsets = [0, 8], sizes = [8, 8], strides = [1, 1]} : vector<8x32xf32> to vector<8x8xf32>
    %43 = vector.shape_cast %42 : vector<8x8xf32> to vector<1x8x8xf32>
    %44 = vector.extract_strided_slice %21 {offsets = [0, 16], sizes = [8, 8], strides = [1, 1]} : vector<8x32xf32> to vector<8x8xf32>
    %45 = vector.shape_cast %44 : vector<8x8xf32> to vector<1x8x8xf32>
    %46 = vector.extract_strided_slice %21 {offsets = [0, 24], sizes = [8, 8], strides = [1, 1]} : vector<8x32xf32> to vector<8x8xf32>
    %47 = vector.shape_cast %46 : vector<8x8xf32> to vector<1x8x8xf32>
    %48 = tpu.concatenate %41, %43, %45, %47 in 0 : vector<1x8x8xf32>, vector<1x8x8xf32>, vector<1x8x8xf32>, vector<1x8x8xf32> -> vector<4x8x8xf32>
    %49 = vector.extract_strided_slice %28 {offsets = [0, 0], sizes = [8, 8], strides = [1, 1]} : vector<8x32xf32> to vector<8x8xf32>
    %50 = vector.shape_cast %49 : vector<8x8xf32> to vector<1x8x8xf32>
    %51 = vector.extract_strided_slice %28 {offsets = [0, 8], sizes = [8, 8], strides = [1, 1]} : vector<8x32xf32> to vector<8x8xf32>
    %52 = vector.shape_cast %51 : vector<8x8xf32> to vector<1x8x8xf32>
    %53 = vector.extract_strided_slice %28 {offsets = [0, 16], sizes = [8, 8], strides = [1, 1]} : vector<8x32xf32> to vector<8x8xf32>
    %54 = vector.shape_cast %53 : vector<8x8xf32> to vector<1x8x8xf32>
    %55 = vector.extract_strided_slice %28 {offsets = [0, 24], sizes = [8, 8], strides = [1, 1]} : vector<8x32xf32> to vector<8x8xf32>
    %56 = vector.shape_cast %55 : vector<8x8xf32> to vector<1x8x8xf32>
    %57 = tpu.concatenate %50, %52, %54, %56 in 0 : vector<1x8x8xf32>, vector<1x8x8xf32>, vector<1x8x8xf32>, vector<1x8x8xf32> -> vector<4x8x8xf32>
    %58 = arith.truncf %39 : vector<4x8x8xf32> to vector<4x8x8xbf16>
    %59 = arith.truncf %48 : vector<4x8x8xf32> to vector<4x8x8xbf16>
    "tpu.trace_start"() <{level = 10 : i32, message = "hqd,hkd->hqk"}> : () -> ()
    %cst_27 = arith.constant dense<0.000000e+00> : vector<4x8x8xf32>
    %60 = tpu.matmul %58, %59, %cst_27 {dimension_numbers = #tpu.dot_dimension_numbers<[2], [2], [1], [1], [0, 0, 0, 1, 1, 1], [0], [0]>} : vector<4x8x8xbf16>, vector<4x8x8xbf16>, vector<4x8x8xf32> -> vector<4x8x8xf32>
    %c0_i32_28 = arith.constant 0 : i32
    "tpu.trace_stop"() : () -> ()
    %61 = vector.broadcast %c0_i32_28 : i32 to vector<1x8xi32>
    %62 = arith.cmpi sgt, %6, %61 : vector<1x8xi32>
    %cst_29 = arith.constant 0xFF800000 : f32
    %63 = vector.shape_cast %62 : vector<1x8xi1> to vector<1x1x8xi1>
    %64 = vector.broadcast %63 : vector<1x1x8xi1> to vector<4x8x8xi1>
    %65 = vector.broadcast %cst_29 : f32 to vector<4x8x8xf32>
    %66 = arith.select %64, %65, %60 : vector<4x8x8xi1>, vector<4x8x8xf32>
    %cst_30 = arith.constant dense<0xFF800000> : vector<4x8xf32>
    %67 = vector.multi_reduction <maximumf>, %66, %cst_30 [2] : vector<4x8x8xf32> to vector<4x8xf32>
    %68 = vector.shape_cast %67 : vector<4x8xf32> to vector<4x8x1xf32>
    %69 = vector.broadcast %68 : vector<4x8x1xf32> to vector<4x8x8xf32>
    %70 = arith.subf %66, %69 : vector<4x8x8xf32>
    %71 = math.exp %70 : vector<4x8x8xf32>
    %cst_31 = arith.constant dense<0.000000e+00> : vector<4x8xf32>
    %72 = vector.multi_reduction <add>, %71, %cst_31 [2] : vector<4x8x8xf32> to vector<4x8xf32>
    %73 = vector.shape_cast %72 : vector<4x8xf32> to vector<4x8x1xf32>
    %74 = tpu.reciprocal %73 {approx = true} : vector<4x8x1xf32> -> vector<4x8x1xf32>
    %75 = vector.broadcast %74 : vector<4x8x1xf32> to vector<4x8x8xf32>
    %76 = arith.mulf %71, %75 : vector<4x8x8xf32>
    %77 = arith.truncf %76 : vector<4x8x8xf32> to vector<4x8x8xbf16>
    %78 = arith.truncf %57 : vector<4x8x8xf32> to vector<4x8x8xbf16>
    "tpu.trace_start"() <{level = 10 : i32, message = "hqk,hkd->hqd"}> : () -> ()
    %cst_32 = arith.constant dense<0.000000e+00> : vector<4x8x8xf32>
    %79 = tpu.matmul %77, %78, %cst_32 {dimension_numbers = #tpu.dot_dimension_numbers<[2], [1], [1], [2], [0, 0, 0, 1, 1, 2], [0], [0]>} : vector<4x8x8xbf16>, vector<4x8x8xbf16>, vector<4x8x8xf32> -> vector<4x8x8xf32>
    "tpu.trace_stop"() : () -> ()
    %80 = vector.extract_strided_slice %79 {offsets = [0, 0, 0], sizes = [1, 8, 8], strides = [1, 1, 1]} : vector<4x8x8xf32> to vector<1x8x8xf32>
    %81 = vector.shape_cast %80 : vector<1x8x8xf32> to vector<8x8xf32>
    %82 = vector.extract_strided_slice %79 {offsets = [1, 0, 0], sizes = [1, 8, 8], strides = [1, 1, 1]} : vector<4x8x8xf32> to vector<1x8x8xf32>
    %83 = vector.shape_cast %82 : vector<1x8x8xf32> to vector<8x8xf32>
    %84 = vector.extract_strided_slice %79 {offsets = [2, 0, 0], sizes = [1, 8, 8], strides = [1, 1, 1]} : vector<4x8x8xf32> to vector<1x8x8xf32>
    %85 = vector.shape_cast %84 : vector<1x8x8xf32> to vector<8x8xf32>
    %86 = vector.extract_strided_slice %79 {offsets = [3, 0, 0], sizes = [1, 8, 8], strides = [1, 1, 1]} : vector<4x8x8xf32> to vector<1x8x8xf32>
    %87 = vector.shape_cast %86 : vector<1x8x8xf32> to vector<8x8xf32>
    %88 = tpu.concatenate %81, %83, %85, %87 in 1 : vector<8x8xf32>, vector<8x8xf32>, vector<8x8xf32>, vector<8x8xf32> -> vector<8x32xf32>
    %89 = arith.truncf %88 : vector<8x32xf32> to vector<8x32xbf16>
    %c0_33 = arith.constant 0 : index
    %c0_34 = arith.constant 0 : index
    %c0_35 = arith.constant 0 : index
    %90 = vector.load %arg15[%c0_33, %c0_34, %c0_35] : memref<1x32x32xbf16, #tpu.memory_space<vmem>>, vector<1x32x32xbf16>
    %91 = vector.shape_cast %90 : vector<1x32x32xbf16> to vector<32x32xbf16>
    %cst_36 = arith.constant dense<0.000000e+00> : vector<8x32xf32>
    %92 = tpu.matmul %89, %91, %cst_36 {dimension_numbers = #tpu.dot_dimension_numbers<[1], [0], [0], [1], [0, 0, 1, 1], [], []>} : vector<8x32xbf16>, vector<32x32xbf16>, vector<8x32xf32> -> vector<8x32xf32>
    %c0_37 = arith.constant 0 : index
    %c0_38 = arith.constant 0 : index
    %c0_39 = arith.constant 0 : index
    %93 = vector.load %arg16[%c0_37, %c0_38, %c0_39] : memref<1x1x32xf32, #tpu.memory_space<vmem>>, vector<1x1x32xf32>
    %94 = vector.shape_cast %93 : vector<1x1x32xf32> to vector<1x32xf32>
    %95 = vector.broadcast %94 : vector<1x32xf32> to vector<8x32xf32>
    %96 = arith.addf %92, %95 : vector<8x32xf32>
    %c0_40 = arith.constant 0 : index
    %c0_41 = arith.constant 0 : index
    %c0_42 = arith.constant 0 : index
    %97 = vector.load %arg21[%c0_40, %c0_41, %c0_42] : memref<1x1x32xf32, #tpu.memory_space<vmem>>, vector<1x1x32xf32>
    %98 = vector.shape_cast %97 : vector<1x1x32xf32> to vector<1x32xf32>
    %c0_43 = arith.constant 0 : index
    %c0_44 = arith.constant 0 : index
    %c0_45 = arith.constant 0 : index
    %99 = vector.load %arg22[%c0_43, %c0_44, %c0_45] : memref<1x1x32xf32, #tpu.memory_space<vmem>>, vector<1x1x32xf32>
    %100 = vector.shape_cast %99 : vector<1x1x32xf32> to vector<1x32xf32>
    %101 = arith.addf %96, %4 : vector<8x32xf32>
    %cst_46 = arith.constant dense<0.000000e+00> : vector<8xf32>
    %102 = vector.multi_reduction <add>, %101, %cst_46 [1] : vector<8x32xf32> to vector<8xf32>
    %103 = vector.shape_cast %102 : vector<8xf32> to vector<8x1xf32>
    %cst_47 = arith.constant 3.200000e+01 : f32
    %104 = vector.broadcast %cst_47 : f32 to vector<8x1xf32>
    %105 = arith.divf %103, %104 : vector<8x1xf32>
    %106 = vector.broadcast %105 : vector<8x1xf32> to vector<8x32xf32>
    %107 = arith.subf %101, %106 : vector<8x32xf32>
    %108 = arith.mulf %107, %107 : vector<8x32xf32>
    %cst_48 = arith.constant dense<0.000000e+00> : vector<8xf32>
    %109 = vector.multi_reduction <add>, %108, %cst_48 [1] : vector<8x32xf32> to vector<8xf32>
    %110 = vector.shape_cast %109 : vector<8xf32> to vector<8x1xf32>
    %cst_49 = arith.constant 3.200000e+01 : f32
    %111 = vector.broadcast %cst_49 : f32 to vector<8x1xf32>
    %112 = arith.divf %110, %111 : vector<8x1xf32>
    %113 = vector.broadcast %105 : vector<8x1xf32> to vector<8x32xf32>
    %114 = arith.subf %101, %113 : vector<8x32xf32>
    %cst_50 = arith.constant 9.99999974E-6 : f32
    %115 = vector.broadcast %cst_50 : f32 to vector<8x1xf32>
    %116 = arith.addf %112, %115 : vector<8x1xf32>
    %117 = math.rsqrt %116 : vector<8x1xf32>
    %118 = vector.broadcast %117 : vector<8x1xf32> to vector<8x32xf32>
    %119 = arith.mulf %114, %118 : vector<8x32xf32>
    %120 = vector.broadcast %98 : vector<1x32xf32> to vector<8x32xf32>
    %121 = arith.mulf %119, %120 : vector<8x32xf32>
    %122 = vector.broadcast %100 : vector<1x32xf32> to vector<8x32xf32>
    %123 = arith.addf %121, %122 : vector<8x32xf32>
    %124 = arith.truncf %123 : vector<8x32xf32> to vector<8x32xbf16>
    %c0_51 = arith.constant 0 : index
    %c0_52 = arith.constant 0 : index
    %c0_53 = arith.constant 0 : index
    %125 = vector.load %arg17[%c0_51, %c0_52, %c0_53] : memref<1x32x128xbf16, #tpu.memory_space<vmem>>, vector<1x32x128xbf16>
    %126 = vector.shape_cast %125 : vector<1x32x128xbf16> to vector<32x128xbf16>
    %cst_54 = arith.constant dense<0.000000e+00> : vector<8x128xf32>
    %127 = tpu.matmul %124, %126, %cst_54 {dimension_numbers = #tpu.dot_dimension_numbers<[1], [0], [0], [1], [0, 0, 1, 1], [], []>} : vector<8x32xbf16>, vector<32x128xbf16>, vector<8x128xf32> -> vector<8x128xf32>
    %c0_55 = arith.constant 0 : index
    %c0_56 = arith.constant 0 : index
    %c0_57 = arith.constant 0 : index
    %128 = vector.load %arg18[%c0_55, %c0_56, %c0_57] : memref<1x1x128xf32, #tpu.memory_space<vmem>>, vector<1x1x128xf32>
    %129 = vector.shape_cast %128 : vector<1x1x128xf32> to vector<1x128xf32>
    %130 = vector.broadcast %129 : vector<1x128xf32> to vector<8x128xf32>
    %131 = arith.addf %127, %130 : vector<8x128xf32>
    %cst_58 = arith.constant 0.000000e+00 : f32
    %132 = vector.broadcast %cst_58 : f32 to vector<8x128xf32>
    %133 = arith.maximumf %131, %132 : vector<8x128xf32>
    %134 = arith.truncf %133 : vector<8x128xf32> to vector<8x128xbf16>
    %c0_59 = arith.constant 0 : index
    %c0_60 = arith.constant 0 : index
    %c0_61 = arith.constant 0 : index
    %135 = vector.load %arg19[%c0_59, %c0_60, %c0_61] : memref<1x128x32xbf16, #tpu.memory_space<vmem>>, vector<1x128x32xbf16>
    %136 = vector.shape_cast %135 : vector<1x128x32xbf16> to vector<128x32xbf16>
    %cst_62 = arith.constant dense<0.000000e+00> : vector<8x32xf32>
    %137 = tpu.matmul %134, %136, %cst_62 {dimension_numbers = #tpu.dot_dimension_numbers<[1], [0], [0], [1], [0, 0, 1, 1], [], []>} : vector<8x128xbf16>, vector<128x32xbf16>, vector<8x32xf32> -> vector<8x32xf32>
    %c0_63 = arith.constant 0 : index
    %c0_64 = arith.constant 0 : index
    %c0_65 = arith.constant 0 : index
    %138 = vector.load %arg20[%c0_63, %c0_64, %c0_65] : memref<1x1x32xf32, #tpu.memory_space<vmem>>, vector<1x1x32xf32>
    %139 = vector.shape_cast %138 : vector<1x1x32xf32> to vector<1x32xf32>
    %140 = vector.broadcast %139 : vector<1x32xf32> to vector<8x32xf32>
    %141 = arith.addf %137, %140 : vector<8x32xf32>
    %142 = arith.addf %141, %123 : vector<8x32xf32>
    %cst_66 = arith.constant dense<0.000000e+00> : vector<8xf32>
    %143 = vector.multi_reduction <add>, %142, %cst_66 [1] : vector<8x32xf32> to vector<8xf32>
    %144 = vector.shape_cast %143 : vector<8xf32> to vector<8x1xf32>
    %cst_67 = arith.constant 3.200000e+01 : f32
    %145 = vector.broadcast %cst_67 : f32 to vector<8x1xf32>
    %146 = arith.divf %144, %145 : vector<8x1xf32>
    %147 = vector.broadcast %146 : vector<8x1xf32> to vector<8x32xf32>
    %148 = arith.subf %142, %147 : vector<8x32xf32>
    %149 = arith.mulf %148, %148 : vector<8x32xf32>
    %cst_68 = arith.constant dense<0.000000e+00> : vector<8xf32>
    %150 = vector.multi_reduction <add>, %149, %cst_68 [1] : vector<8x32xf32> to vector<8xf32>
    %151 = vector.shape_cast %150 : vector<8xf32> to vector<8x1xf32>
    %cst_69 = arith.constant 3.200000e+01 : f32
    %152 = vector.broadcast %cst_69 : f32 to vector<8x1xf32>
    %153 = arith.divf %151, %152 : vector<8x1xf32>
    %154 = vector.broadcast %146 : vector<8x1xf32> to vector<8x32xf32>
    %155 = arith.subf %142, %154 : vector<8x32xf32>
    %cst_70 = arith.constant 9.99999974E-6 : f32
    %156 = vector.broadcast %cst_70 : f32 to vector<8x1xf32>
    %157 = arith.addf %153, %156 : vector<8x1xf32>
    %158 = math.rsqrt %157 : vector<8x1xf32>
    %159 = vector.broadcast %158 : vector<8x1xf32> to vector<8x32xf32>
    %160 = arith.mulf %155, %159 : vector<8x32xf32>
    %161 = vector.broadcast %98 : vector<1x32xf32> to vector<8x32xf32>
    %162 = arith.mulf %160, %161 : vector<8x32xf32>
    %163 = vector.broadcast %100 : vector<1x32xf32> to vector<8x32xf32>
    %164 = arith.addf %162, %163 : vector<8x32xf32>
    %c0_71 = arith.constant 0 : index
    %c0_72 = arith.constant 0 : index
    %c0_73 = arith.constant 0 : index
    %165 = vector.load %arg23[%c0_71, %c0_72, %c0_73] : memref<1x8x32xf32, #tpu.memory_space<vmem>>, vector<1x8x32xf32>
    %166 = vector.shape_cast %165 : vector<1x8x32xf32> to vector<8x32xf32>
    %167 = vector.shape_cast %164 : vector<8x32xf32> to vector<1x8x32xf32>
    tpu.vector_store %arg23[%c0_71, %c0_72, %c0_73], %167 {strides = array<i32>} : memref<1x8x32xf32, #tpu.memory_space<vmem>>, vector<1x8x32xf32>,
    return
  }
  func.func @transform_0(%arg0: i32, %arg1: i32) -> (i32, i32, i32) {
    %c0_i32 = arith.constant 0 : i32
    %c0_i32_0 = arith.constant 0 : i32
    %c0_i32_1 = arith.constant 0 : i32
    return %arg0, %c0_i32, %c0_i32_0 : i32, i32, i32
  }
  func.func @transform_1(%arg0: i32, %arg1: i32) -> (i32, i32, i32) {
    %c0_i32 = arith.constant 0 : i32
    %c0_i32_0 = arith.constant 0 : i32
    %c0_i32_1 = arith.constant 0 : i32
    return %arg0, %c0_i32, %c0_i32_0 : i32, i32, i32
  }
  func.func @transform_2(%arg0: i32, %arg1: i32) -> (i32, i32, i32) {
    %c0_i32 = arith.constant 0 : i32
    %c0_i32_0 = arith.constant 0 : i32
    %c0_i32_1 = arith.constant 0 : i32
    return %arg0, %c0_i32, %c0_i32_0 : i32, i32, i32
  }
  func.func @transform_3(%arg0: i32, %arg1: i32) -> (i32, i32, i32) {
    %c0_i32 = arith.constant 0 : i32
    %c0_i32_0 = arith.constant 0 : i32
    %c0_i32_1 = arith.constant 0 : i32
    return %arg0, %c0_i32, %c0_i32_0 : i32, i32, i32
  }
  func.func @transform_4(%arg0: i32, %arg1: i32) -> (i32, i32, i32) {
    %c0_i32 = arith.constant 0 : i32
    %c0_i32_0 = arith.constant 0 : i32
    %c0_i32_1 = arith.constant 0 : i32
    return %arg0, %c0_i32, %c0_i32_0 : i32, i32, i32
  }
  func.func @transform_5(%arg0: i32, %arg1: i32) -> (i32, i32) {
    %c0_i32 = arith.constant 0 : i32
    %c0_i32_0 = arith.constant 0 : i32
    %c0_i32_1 = arith.constant 0 : i32
    return %c0_i32, %c0_i32_0 : i32, i32
  }
  func.func @transform_6(%arg0: i32, %arg1: i32) -> (i32, i32) {
    %c0_i32 = arith.constant 0 : i32
    %c0_i32_0 = arith.constant 0 : i32
    %c0_i32_1 = arith.constant 0 : i32
    return %c0_i32, %c0_i32_0 : i32, i32
  }
  func.func @transform_7(%arg0: i32, %arg1: i32) -> (i32, i32, i32) {
    %c0_i32 = arith.constant 0 : i32
    %c0_i32_0 = arith.constant 0 : i32
    %c0_i32_1 = arith.constant 0 : i32
    return %arg1, %c0_i32, %c0_i32_0 : i32, i32, i32
  }
  func.func @transform_8(%arg0: i32, %arg1: i32) -> (i32, i32, i32) {
    %c0_i32 = arith.constant 0 : i32
    %c0_i32_0 = arith.constant 0 : i32
    %c0_i32_1 = arith.constant 0 : i32
    return %arg1, %c0_i32, %c0_i32_0 : i32, i32, i32
  }
  func.func @transform_9(%arg0: i32, %arg1: i32) -> (i32, i32, i32) {
    %c0_i32 = arith.constant 0 : i32
    %c0_i32_0 = arith.constant 0 : i32
    %c0_i32_1 = arith.constant 0 : i32
    return %arg1, %c0_i32, %c0_i32_0 : i32, i32, i32
  }
  func.func @transform_10(%arg0: i32, %arg1: i32) -> (i32, i32, i32) {
    %c0_i32 = arith.constant 0 : i32
    %c0_i32_0 = arith.constant 0 : i32
    %c0_i32_1 = arith.constant 0 : i32
    return %arg1, %c0_i32, %c0_i32_0 : i32, i32, i32
  }
  func.func @transform_11(%arg0: i32, %arg1: i32) -> (i32, i32, i32) {
    %c0_i32 = arith.constant 0 : i32
    %c0_i32_0 = arith.constant 0 : i32
    %c0_i32_1 = arith.constant 0 : i32
    return %arg1, %c0_i32, %c0_i32_0 : i32, i32, i32
  }
  func.func @transform_12(%arg0: i32, %arg1: i32) -> (i32, i32, i32) {
    %c0_i32 = arith.constant 0 : i32
    %c0_i32_0 = arith.constant 0 : i32
    %c0_i32_1 = arith.constant 0 : i32
    return %arg1, %c0_i32, %c0_i32_0 : i32, i32, i32
  }
  func.func @transform_13(%arg0: i32, %arg1: i32) -> (i32, i32, i32) {
    %c0_i32 = arith.constant 0 : i32
    %c0_i32_0 = arith.constant 0 : i32
    %c0_i32_1 = arith.constant 0 : i32
    return %arg1, %c0_i32, %c0_i32_0 : i32, i32, i32
  }
  func.func @transform_14(%arg0: i32, %arg1: i32) -> (i32, i32, i32) {
    %c0_i32 = arith.constant 0 : i32
    %c0_i32_0 = arith.constant 0 : i32
    %c0_i32_1 = arith.constant 0 : i32
    return %arg1, %c0_i32, %c0_i32_0 : i32, i32, i32
  }
  func.func @transform_15(%arg0: i32, %arg1: i32) -> (i32, i32, i32) {
    %c0_i32 = arith.constant 0 : i32
    %c0_i32_0 = arith.constant 0 : i32
    %c0_i32_1 = arith.constant 0 : i32
    return %arg1, %c0_i32, %c0_i32_0 : i32, i32, i32
  }
  func.func @transform_16(%arg0: i32, %arg1: i32) -> (i32, i32, i32) {
    %c0_i32 = arith.constant 0 : i32
    %c0_i32_0 = arith.constant 0 : i32
    %c0_i32_1 = arith.constant 0 : i32
    return %arg1, %c0_i32, %c0_i32_0 : i32, i32, i32
  }
  func.func @transform_17(%arg0: i32, %arg1: i32) -> (i32, i32, i32) {
    %c0_i32 = arith.constant 0 : i32
    %c0_i32_0 = arith.constant 0 : i32
    %c0_i32_1 = arith.constant 0 : i32
    return %arg1, %c0_i32, %c0_i32_0 : i32, i32, i32
  }
  func.func @transform_18(%arg0: i32, %arg1: i32) -> (i32, i32, i32) {
    %c0_i32 = arith.constant 0 : i32
    %c0_i32_0 = arith.constant 0 : i32
    %c0_i32_1 = arith.constant 0 : i32
    return %arg1, %c0_i32, %c0_i32_0 : i32, i32, i32
  }
  func.func @transform_19(%arg0: i32, %arg1: i32) -> (i32, i32, i32) {
    %c0_i32 = arith.constant 0 : i32
    %c0_i32_0 = arith.constant 0 : i32
    %c0_i32_1 = arith.constant 0 : i32
    return %arg1, %c0_i32, %c0_i32_0 : i32, i32, i32
  }
  func.func @transform_20(%arg0: i32, %arg1: i32) -> (i32, i32, i32) {
    %c0_i32 = arith.constant 0 : i32
    %c0_i32_0 = arith.constant 0 : i32
    %c0_i32_1 = arith.constant 0 : i32
    return %arg1, %c0_i32, %c0_i32_0 : i32, i32, i32
  }
  func.func @transform_21(%arg0: i32, %arg1: i32) -> (i32, i32, i32) {
    %c0_i32 = arith.constant 0 : i32
    %c0_i32_0 = arith.constant 0 : i32
    %c0_i32_1 = arith.constant 0 : i32
    return %arg0, %c0_i32, %c0_i32_0 : i32, i32, i32
  }
}

</mosaic_0001>

<bundles_post_ra>
// kernel: tpu_custom_call.1
= control target key start
LH: loop header
LB: loop body
LE: loop exit
PB: predicated region body
PF: predicated region fallthrough
CT: control target
= control target key end

     0   :  { %s3911_s0 = inlined_call_operand.hbm [shape: f32[2,8,16], index: 0, kind: input, shape index: {}]   ;;  %s3912_s1 = inlined_call_operand.hbm [shape: f32[2,8,8], index: 1, kind: input, shape index: {}]   ;;  %s3913_s2 = inlined_call_operand.hbm [shape: f32[2,8,8], index: 2, kind: input, shape index: {}]   ;;  %s3914_s3 = inlined_call_operand.hbm [shape: f32[2,8,8], index: 3, kind: input, shape index: {}]   ;;  %s3915_s4 = inlined_call_operand.vmem [shape: s32[2,1,8], index: 4, kind: input, shape index: {}]   ;;  %s3916_s5 = inlined_call_operand.vmem [shape: bf16[16,32], index: 5, kind: input, shape index: {}]   ;;  %s3917_s6 = inlined_call_operand.hbm [shape: f32[1,32], index: 6, kind: input, shape index: {}]   ;;  %s3918_s7 = inlined_call_operand.vmem [shape: bf16[2,32,32], index: 7, kind: input, shape index: {}]   ;;  %s3919_s8 = inlined_call_operand.vmem [shape: f32[2,1,32], index: 8, kind: input, shape index: {}]   ;;  %s3920_s9 = inlined_call_operand.vmem [shape: bf16[2,32,32], index: 9, kind: input, shape index: {}]   ;;  %s3921_s10 = inlined_call_operand.vmem [shape: f32[2,1,32], index: 10, kind: input, shape index: {}]   ;;  %s3922_s11 = inlined_call_operand.vmem [shape: bf16[2,32,32], index: 11, kind: input, shape index: {}]   ;;  %s3923_s12 = inlined_call_operand.vmem [shape: f32[2,1,32], index: 12, kind: input, shape index: {}]   ;;  %s3924_s13 = inlined_call_operand.vmem [shape: bf16[2,32,32], index: 13, kind: input, shape index: {}]   ;;  %s3925_s14 = inlined_call_operand.vmem [shape: f32[2,1,32], index: 14, kind: input, shape index: {}]   ;;  %s3926_s15 = inlined_call_operand.vmem [shape: bf16[2,32,128], index: 15, kind: input, shape index: {}]   ;;  %s3927_s16 = inlined_call_operand.vmem [shape: f32[2,1,128], index: 16, kind: input, shape index: {}]   ;;  %s3928_s17 = inlined_call_operand.vmem [shape: bf16[2,128,32], index: 17, kind: input, shape index: {}]   ;;  %s3929_s18 = inlined_call_operand.vmem [shape: f32[2,1,32], index: 18, kind: input, shape index: {}]   ;;  %s3930_s19 = inlined_call_operand.vmem [shape: f32[2,1,32], index: 19, kind: input, shape index: {}]   ;;  %s3931_s20 = inlined_call_operand.vmem [shape: f32[2,1,32], index: 20, kind: input, shape index: {}]   ;;  %s3932_s21 = inlined_call_operand.hbm [shape: f32[2,8,32], index: 21, kind: output, shape index: {}]  }
   0x1   :  { %3964 = sst [smem:[#allocation30_spill]] %s3911_s0 }
   0x2   :  { %3965 = sst [smem:[#allocation31_spill]] %s3912_s1 }
   0x3   :  { %3966 = sst [smem:[#allocation32_spill]] %s3913_s2 }
   0x4   :  { %3967 = sst [smem:[#allocation33_spill]] %s3914_s3 }
   0x5   :  { %3968 = sst [smem:[#allocation34_spill]] %s3915_s4 }
   0x6   :  { %3969 = sst [smem:[#allocation35_spill]] %s3916_s5 }
   0x7   :  { %3970 = sst [smem:[#allocation36_spill]] %s3917_s6 }
   0x8   :  { %3971 = sst [smem:[#allocation37_spill]] %s3918_s7 }
   0x9   :  { %3972 = sst [smem:[#allocation38_spill]] %s3920_s9 }
   0xa   :  { %3973 = sst [smem:[#allocation39_spill]] %s3921_s10 }
   0xb   :  { %3974 = sst [smem:[#allocation40_spill]] %s3922_s11 }
   0xc   :  { %3975 = sst [smem:[#allocation41_spill]] %s3923_s12 }
   0xd   :  { %3976 = sst [smem:[#allocation42_spill]] %s3924_s13 }
   0xe   :  { %3977 = sst [smem:[#allocation43_spill]] %s3925_s14 }
   0xf   :  { %3978 = sst [smem:[#allocation44_spill]] %s3926_s15 }
  0x10   :  { %3979 = sst [smem:[#allocation45_spill]] %s3927_s16 }
  0x11   :  { %3980 = sst [smem:[#allocation46_spill]] %s3928_s17 }
  0x12   :  { %3981 = sst [smem:[#allocation47_spill]] %s3929_s18 }
  0x13   :  { %3982 = sst [smem:[#allocation48_spill]] %s3930_s19 }
  0x14   :  { %3983 = sst [smem:[#allocation49_spill]] %s3931_s20 }
  0x15   :  { %3984 = sst [smem:[#allocation50_spill]] %s3932_s21 }
  0x16   :  { %26 = vsyncpa [#allocation3], 0 }
  0x17   :  { %28 = vsyncpa [#allocation3 + $0x1], 0 }
  0x18   :  { %29 = vsyncpa [#allocation6], 0 }
  0x19   :  { %31 = vsyncpa [#allocation6 + $0x1], 0 }
  0x1a   :  { %32 = vsyncpa [#allocation9], 0 }
  0x1b   :  { %34 = vsyncpa [#allocation9 + $0x1], 0 }
  0x1c   :  { %35 = vsyncpa [#allocation4], 0 }
  0x1d   :  { %37 = vsyncpa [#allocation4 + $0x1], 0  ;;  %s3283_s2 = smov 0   ;;  %s3285_s25 = smov 0  }
  0x1e   :  { %s3287_s26 = smov 0   ;;  %s3289_s27 = smov 0  }
  0x1f   :  { %s3291_s3 = smov 0   ;;  %s3293_s28 = smov 0  }
  0x20   :  { %s3295_s29 = smov 0   ;;  %s3297_s0 = smov 0  }
  0x21 LB: > { %3985 = sst [smem:[#allocation17_spill]] %s3119_s2  ;;  %s3324_s4 = sadd.s32 4294967295, %s3147_s0   ;;  %s3147_s0 = sphi %s3297_s0, %s43_s0   ;;  %s3143_s29 = sphi %s3295_s29, %s4072_s29   ;;  %s3139_s28 = sphi %s3293_s28, %s4071_s28   ;;  %s3135_s3 = sphi %s3291_s3, %s4070_s3   ;;  %s3131_s27 = sphi %s3289_s27, %s4069_s27   ;;  %s3127_s26 = sphi %s3287_s26, %s4068_s26   ;;  %s3123_s25 = sphi %s3285_s25, %s4067_s25   ;;  %s3119_s2 = sphi %s3283_s2, %s4066_s2  }
  0x22   : > { %3986 = sst [smem:[#allocation18_spill]] %s3123_s25  ;;  %s2488_s30 = sadd.s32 4294967294, %s3147_s0  }
  0x23   : > { %3987 = sst [smem:[#allocation19_spill]] %s3127_s26  ;;  %p69_p0 = scmp.ne.s32.totalorder %s3127_s26, %s3123_s25 }
  0x24   : > { %3988 = sst [smem:[#allocation20_spill]] %s3135_s3  ;;  %p70_p1 = scmp.eq.s32.totalorder %s3147_s0, 0 }
  0x25   : > { %3989 = sst [smem:[#allocation21_spill]] %s3139_s28  ;;  %p75_p2 = scmp.ne.s32.totalorder %s3123_s25, %s3119_s2 }
  0x26   : > { %3990 = sst [smem:[#allocation22_spill]] %s3143_s29  ;;  %p3943_p3 = scmp.eq.s32.totalorder %s3324_s4, 0 }
  0x27   : > { %3991 = sst [smem:[#allocation23_spill]] %s3147_s0  ;;  %p609_p4 = scmp.eq.s32.totalorder %s3324_s4, 3 }
  0x28   : > { %p3335_p5 = por %p70_p1, %p69_p0  ;;  %p615_p6 = scmp.eq.s32.totalorder %s2488_s30, 3 }
  0x29   : > { %p3341_p7 = por %p3943_p3, %p75_p2  ;;  %p3345_p8 = por %p609_p4, %p69_p0 }
  0x2a   : > { %s3992_s22 = scalar_select %p3335_p5, 1, 0 }
  0x2b   : > { %s3993_s23 = scalar_select %p3341_p7, 1, 0 }
  0x2c   : > { %s3994_s1 = scalar_select %p3345_p8, 1, 0 }
  0x2d   : > { %p3349_p9 = por %p615_p6, %p75_p2  ;;  %p2489_p10 = scmp.ge.s32.totalorder %s3147_s0, 1 }
  0x2e   : > { %3995 = sst [smem:[#allocation24_spill]] %s3994_s1  ;;  %p622_p11 = scmp.lt.s32.totalorder %s3147_s0, 5 }
  0x2f   : > { %s3996_s24 = scalar_select %p3349_p9, 1, 0 }
  0x30   : > { %p3355_p12 = pnand %p2489_p10, %p622_p11  ;;  %s3149_s30 = smov [#allocation10]  }
  0x31   : > { %3997 = sst [smem:[#allocation25_spill]] %s3996_s24  ;;  %s638_s2 = sshll.u32 %s3149_s30, 4  ;;  %s639_s2 = int_to_ptr.vmem [resolvable:$true] %s638_s2 }
  0x32   : > { %s3998_s5 = scalar_select %p3355_p12, 1, 0 }
  0x33   : > { %p2742_p13 = pneg %p3355_p12  ;;  %s52_s1 = sadd.s32 1, %s3139_s28 }
  0x34   : > { %p3368_p1 = scmp.ge.s32.totalorder %s52_s1, 2  ;;  %s55_s20 = sadd.s32 1, %s3143_s29 }
  0x35   : > { %p3363_p0 = pnand %p2742_p13, %p3943_p3  ;;  %s4001_s6 = sld [smem:[#allocation36_spill]] }
  0x36   : > { %s4000_s24 = scalar_select %p3368_p1, 1, 0 }
  0x37   : > { %p2891_p6 = pneg %p3363_p0 }
  0x3b   : > { %s2889_s30 = scalar_lea.hbm %s4001_s6, 16 }
  0x3c   : > { %p2890_p4 = scmp.ne.s32.totalorder %s4001_s6, %s2889_s30  ;;  %p2896_p13 = scmp.lt.u32.totalorder %s2889_s30, %s4001_s6 }
  0x3e   : > { %p2892_p10 = pnand %p2891_p6, %p2890_p4 }
  0x40   : > { %p2893_p11 = pneg %p2892_p10 }
  0x42   : > { %p2898_p3 = pnand %p2896_p13, %p2893_p11 }
  0x44   : > { %2901 = shalt.err (!%p2898_p3)
}
  0x45   : > { %s2902_s14 = scalar_lea.vmem %s639_s2, 16  ;;  %s2909_s18 = scalar_lea.vmem %s639_s2, 32 }
  0x46   : > { %p2903_p2 = scmp.ne.s32.totalorder %s639_s2, %s2902_s14  ;;  %p2910_p7 = scmp.lt.s32.totalorder %s639_s2, %s639_s2 }
  0x47   : > { %p2911_p12 = scmp.lt.s32.totalorder %s2909_s18, %s2902_s14 }
  0x48   : > { %p2905_p9 = pnand %p2903_p2, %p2891_p6 }
  0x49   : > { %p2912_p5 = por %p2911_p12, %p2910_p7 }
  0x4a   : > { %p2906_p8 = pneg %p2905_p9 }
  0x4c   : > { %p2913_p1 = pnand %p2912_p5, %p2906_p8 }
  0x4e   : > { %2916 = shalt.err (!%p2913_p1)
}
  0x4f   : > { %2745 = dma.hbm_to_vmem [thread:$0]  (!%p3363_p0), %s4001_s6, 16, %s639_s2, [#allocation9]  }
  0x50   : > { %p4002_p3 = scmp.ne.s32.totalorder %s4000_s24, 0  ;;  %s3948_s14 = sand.u32 1, %s3127_s26  }
  0x51   : > { %s3399_s15 = sshll.u32 %s3143_s29, 7  ;;  %s3403_s19 = sshll.u32 %s3948_s14, 3 }
  0x52   : > { %s4074_s1 = smov (%p4002_p3, %s52_s1), 0  ;;  %s4076_s20 = smov (!%p4002_p3, %s55_s20), %s3143_s29 }
  0x53   : > { %4003 = sst [smem:[#allocation26_spill]] %s4074_s1  ;;  %p57_p5 = scmp.ge.s32.totalorder %s4076_s20, 2 }
  0x54   : > { %p4004_p7 = scmp.ne.s32.totalorder %s3992_s22, 0  ;;  %p4005_p8 = scmp.lt.s32.totalorder %s3147_s0, 4 }
  0x55   : > { %s3951_s2 = sand.u32 1, %s3147_s0   ;;  %s4078_s20 = smov (%p57_p5, %s4076_s20), 0 }
  0x56   : > { %p3409_p9 = pnand %p4005_p8, %p4004_p7  ;;  %4007 = sst [smem:[#allocation27_spill]] %s4078_s20 }
  0x57   : > { %s59_s28 = ssub.s32 %s3143_s29, %s4078_s20  ;;  %s4008_s18 = sld [smem:[#allocation31_spill]] }
  0x58   : > { %s4006_s21 = scalar_select %p3409_p9, 1, 0 }
  0x59   : > { %p60_p12 = scmp.eq.s32.totalorder %s59_s28, 0  ;;  %s671_s22 = scalar_lea.vmem [#allocation5], %s3403_s19 }
  0x5a   : > { %s678_s17 = sshll.u32 %s671_s22, 4  ;;  %s4009_s14 = sadd.s32 1, %s3127_s26  ;;  %s3430_s17 = int_to_ptr.vmem [resolvable:$true] %s678_s17 }
  0x5b   : > { %s3428_s6 = scalar_select %p60_p12, %s3127_s26, %s4009_s14  }
  0x5c   : > { %s3434_s1 = scalar_lea.sflag [#allocation6], %s3951_s2  ;;  %p3440_p1 = pneg %p3409_p9 }
  0x5d   : > { %s3422_s16 = scalar_lea.hbm %s4008_s18, %s3399_s15  ;;  %4010 = sst [smem:[#allocation28_spill]] %s3428_s6 }
  0x5e   : > { %s2917_s28 = scalar_lea.hbm %s3422_s16, 128  ;;  %s2922_s14 = scalar_lea.hbm %s4008_s18, 256 }
  0x5f   : > { %p2918_p0 = scmp.ne.s32.totalorder %s3422_s16, %s2917_s28  ;;  %p2923_p6 = scmp.lt.u32.totalorder %s3422_s16, %s4008_s18 }
  0x60   : > { %p2924_p10 = scmp.lt.u32.totalorder %s2922_s14, %s2917_s28  ;;  %p2926_p13 = scmp.lt.u32.totalorder %s2917_s28, %s3422_s16 }
  0x61   : > { %p2920_p2 = pnand %p3440_p1, %p2918_p0 }
  0x62   : > { %p2925_p11 = por %p2924_p10, %p2923_p6 }
  0x63   : > { %p2921_p4 = pneg %p2920_p2 }
  0x64   : > { %p2927_p3 = por %p2926_p13, %p2925_p11 }
  0x66   : > { %p2928_p5 = pnand %p2927_p3, %p2921_p4 }
  0x68   : > { %2931 = shalt.err (!%p2928_p5)
}
  0x69   : > { %s2932_s2 = scalar_lea.vmem %s3430_s17, 128  ;;  %s3150_s30 = smov [#allocation5]  }
  0x6a   : > { %p2933_p7 = scmp.ne.s32.totalorder %s3430_s17, %s2932_s2  ;;  %s2937_s22 = sshll.u32 %s3150_s30, 4  ;;  %s2938_s22 = int_to_ptr.vmem [resolvable:$false] %s2937_s22 }
  0x6b   : > { %s2939_s20 = scalar_lea.vmem %s2938_s22, 256  ;;  %p2940_p0 = scmp.lt.s32.totalorder %s3430_s17, %s2938_s22 }
  0x6c   : > { %p2935_p8 = pnand %p2933_p7, %p3440_p1  ;;  %p2941_p2 = scmp.lt.s32.totalorder %s2939_s20, %s2932_s2 }
  0x6e   : > { %p2936_p12 = pneg %p2935_p8  ;;  %p2942_p6 = por %p2941_p2, %p2940_p0 }
  0x70   : > { %p2943_p10 = pnand %p2942_p6, %p2936_p12 }
  0x72   : > { %2946 = shalt.err (!%p2943_p10)
}
  0x73   : > { %2752 = dma.hbm_to_vmem [thread:$0]  (!%p3409_p9), %s3422_s16, 128, %s3430_s17, %s3434_s1  }
  0x74   : > { %s4012_s14 = sld [smem:[#allocation30_spill]]  ;;  %s653_s2 = scalar_lea.vmem [#allocation2], %s3403_s19 }
  0x75   : > { %s660_s22 = sshll.u32 %s653_s2, 4  ;;  %s4013_s6 = sld [smem:[#allocation32_spill]]  ;;  %s3471_s22 = int_to_ptr.vmem [resolvable:$true] %s660_s22 }
  0x76   : > { %s4014_s12 = sand.u32 1, %s3127_s26  }
  0x77   : > { %s650_s16 = scalar_lea.sflag [#allocation3], %s4014_s12 }
  0x7a   : > { %s3468_s30 = scalar_lea.hbm %s4012_s14, %s3399_s15  ;;  %s2952_s11 = scalar_lea.hbm %s4012_s14, 256 }
  0x7b   : > { %s3477_s13 = scalar_lea.hbm %s4013_s6, %s3399_s15  ;;  %s2947_s17 = scalar_lea.hbm %s3468_s30, 128 }
  0x7c   : > { %p2948_p4 = scmp.ne.s32.totalorder %s3468_s30, %s2947_s17  ;;  %p2953_p3 = scmp.lt.u32.totalorder %s3468_s30, %s4012_s14 }
  0x7d   : > { %p2954_p5 = scmp.lt.u32.totalorder %s2952_s11, %s2947_s17  ;;  %p2956_p8 = scmp.lt.u32.totalorder %s2947_s17, %s3468_s30 }
  0x7e   : > { %p2950_p11 = pnand %p2948_p4, %p3440_p1 }
  0x7f   : > { %p2955_p7 = por %p2954_p5, %p2953_p3 }
  0x80   : > { %p2951_p13 = pneg %p2950_p11 }
  0x81   : > { %p2957_p12 = por %p2956_p8, %p2955_p7 }
  0x83   : > { %p2958_p0 = pnand %p2957_p12, %p2951_p13 }
  0x85   : > { %2961 = shalt.err (!%p2958_p0)
}
  0x86   : > { %s2962_s12 = scalar_lea.vmem %s3471_s22, 128  ;;  %s3151_s18 = smov [#allocation2]  }
  0x87   : > { %p2963_p2 = scmp.ne.s32.totalorder %s3471_s22, %s2962_s12  ;;  %s2967_s20 = sshll.u32 %s3151_s18, 4  ;;  %s2968_s20 = int_to_ptr.vmem [resolvable:$false] %s2967_s20 }
  0x88   : > { %s2969_s10 = scalar_lea.vmem %s2968_s20, 256  ;;  %p2970_p4 = scmp.lt.s32.totalorder %s3471_s22, %s2968_s20 }
  0x89   : > { %p2965_p6 = pnand %p2963_p2, %p3440_p1  ;;  %p2971_p11 = scmp.lt.s32.totalorder %s2969_s10, %s2962_s12 }
  0x8b   : > { %p2966_p10 = pneg %p2965_p6  ;;  %p2972_p3 = por %p2971_p11, %p2970_p4 }
  0x8d   : > { %p2973_p5 = pnand %p2972_p3, %p2966_p10 }
  0x8f   : > { %2976 = shalt.err (!%p2973_p5)
}
  0x90   : > { %2749 = dma.hbm_to_vmem [thread:$0]  (!%p3409_p9), %s3468_s30, 128, %s3471_s22, %s650_s16  }
  0x91   : > { %s689_s11 = scalar_lea.vmem [#allocation7], %s3403_s19  ;;  %s4015_s2 = sld [smem:[#allocation33_spill]] }
  0x92   : > { %s696_s17 = sshll.u32 %s689_s11, 4  ;;  %s2977_s20 = scalar_lea.hbm %s3477_s13, 128  ;;  %s697_s17 = int_to_ptr.vmem [resolvable:$true] %s696_s17 }
  0x93   : > { %p2978_p13 = scmp.ne.s32.totalorder %s3477_s13, %s2977_s20  ;;  %s2982_s26 = scalar_lea.hbm %s4013_s6, 256 }
  0x94   : > { %p2983_p12 = scmp.lt.u32.totalorder %s3477_s13, %s4013_s6  ;;  %p2984_p0 = scmp.lt.u32.totalorder %s2982_s26, %s2977_s20 }
  0x95   : > { %p2980_p7 = pnand %p2978_p13, %p3440_p1  ;;  %p2986_p6 = scmp.lt.u32.totalorder %s2977_s20, %s3477_s13 }
  0x96   : > { %p2985_p2 = por %p2984_p0, %p2983_p12 }
  0x97   : > { %s4016_s12 = smov %s4015_s2  ;;  %s3507_s18 = scalar_lea.hbm %s4015_s2, %s3399_s15 }
  0x98   : > { %p2981_p8 = pneg %p2980_p7  ;;  %p2987_p10 = por %p2986_p6, %p2985_p2 }
  0x9a   : > { %p2988_p4 = pnand %p2987_p10, %p2981_p8 }
  0x9c   : > { %2991 = shalt.err (!%p2988_p4)
}
  0x9d   : > { %s2992_s15 = scalar_lea.vmem %s697_s17, 128  ;;  %s3152_s30 = smov [#allocation7]  }
  0x9e   : > { %p2993_p11 = scmp.ne.s32.totalorder %s697_s17, %s2992_s15  ;;  %s2997_s22 = sshll.u32 %s3152_s30, 4  ;;  %s2998_s22 = int_to_ptr.vmem [resolvable:$false] %s2997_s22 }
  0x9f   : > { %s2999_s14 = scalar_lea.vmem %s2998_s22, 256  ;;  %p3000_p13 = scmp.lt.s32.totalorder %s697_s17, %s2998_s22 }
  0xa0   : > { %p2995_p3 = pnand %p2993_p11, %p3440_p1  ;;  %p3001_p7 = scmp.lt.s32.totalorder %s2999_s14, %s2992_s15 }
  0xa2   : > { %p2996_p5 = pneg %p2995_p3  ;;  %p3002_p9 = por %p3001_p7, %p3000_p13 }
  0xa4   : > { %p3003_p0 = pnand %p3002_p9, %p2996_p5 }
  0xa6   : > { %3006 = shalt.err (!%p3003_p0)
}
  0xa7   : > { %p4017_p12 = scmp.ne.s32.totalorder %s4006_s21, 0  ;;  %s707_s7 = scalar_lea.vmem [#allocation8], %s3403_s19 }
  0xa8   : > { %s714_s9 = sshll.u32 %s707_s7, 4  ;;  %s4018_s26 = sand.u32 1, %s3147_s0   ;;  %s715_s9 = int_to_ptr.vmem [resolvable:$true] %s714_s9 }
  0xa9   : > { %2755 = dma.hbm_to_vmem [thread:$0]  (!%p4017_p12), %s3477_s13, 128, %s697_s17, %s3434_s1  }
  0xaa   : > { %s704_s16 = scalar_lea.sflag [#allocation9], %s4018_s26  ;;  %s3007_s11 = scalar_lea.hbm %s3507_s18, 128 }
  0xab   : > { %p3008_p9 = scmp.ne.s32.totalorder %s3507_s18, %s3007_s11  ;;  %s3012_s2 = scalar_lea.hbm %s4016_s12, 256 }
  0xac   : > { %p3013_p6 = scmp.lt.u32.totalorder %s3507_s18, %s4016_s12  ;;  %p3014_p10 = scmp.lt.u32.totalorder %s3012_s2, %s3007_s11 }
  0xad   : > { %p3010_p8 = pnand %p3008_p9, %p3440_p1  ;;  %p3016_p11 = scmp.lt.u32.totalorder %s3007_s11, %s3507_s18 }
  0xae   : > { %p3015_p4 = por %p3014_p10, %p3013_p6 }
  0xaf   : > { %p3011_p2 = pneg %p3010_p8 }
  0xb0   : > { %p3017_p3 = por %p3016_p11, %p3015_p4 }
  0xb2   : > { %p3018_p5 = pnand %p3017_p3, %p3011_p2 }
  0xb4   : > { %3021 = shalt.err (!%p3018_p5)
}
  0xb5   : > { %s3022_s13 = scalar_lea.vmem %s715_s9, 128  ;;  %s3153_s1 = smov [#allocation8]  }
  0xb6   : > { %p3023_p13 = scmp.ne.s32.totalorder %s715_s9, %s3022_s13  ;;  %s3027_s19 = sshll.u32 %s3153_s1, 4  ;;  %s3028_s19 = int_to_ptr.vmem [resolvable:$false] %s3027_s19 }
  0xb7   : > { %s3029_s17 = scalar_lea.vmem %s3028_s19, 256  ;;  %p3030_p9 = scmp.lt.s32.totalorder %s715_s9, %s3028_s19 }
  0xb8   : > { %p3025_p7 = pnand %p3023_p13, %p3440_p1  ;;  %p3031_p8 = scmp.lt.s32.totalorder %s3029_s17, %s3022_s13 }
  0xba   : > { %p3026_p0 = pneg %p3025_p7  ;;  %p3032_p12 = por %p3031_p8, %p3030_p9 }
  0xbc   : > { %p3033_p6 = pnand %p3032_p12, %p3026_p0 }
  0xbe   : > { %3036 = shalt.err (!%p3033_p6)
}
  0xbf   : > { %p4019_p10 = scmp.ne.s32.totalorder %s4006_s21, 0  ;;  %p4020_p2 = scmp.ne.s32.totalorder %s3998_s5, 0 }
  0xc1   : > { %2758 = dma.hbm_to_vmem [thread:$0]  (!%p4019_p10), %s3507_s18, 128, %s715_s9, %s704_s16  }
  0xc2   : > { %825 = sbr.rel (%p4020_p2) target bundleno = 3090 (0xc12), region = 104 }
  0xc9   : > { %s3550_s24 = sand.u32 1, %s3123_s25   ;;  %p4022_p1 = scmp.ne.s32.totalorder %s3993_s23, 0 }
  0xca   : > { %4021 = sst [smem:[#allocation29_spill]] %s3550_s24  ;;  %s3553_s15 = sshll.u32 %s3550_s24, 3 }
  0xcb   : > { %s828_s30 = scalar_lea.sflag [#allocation3], %s3550_s24 }
  0xcc   : > { %3098 = dma.done.wait (%p4022_p1), %s828_s30, 128  }
  0xcd   : > { %3100 = vsyncadd (%p4022_p1), %s828_s30, 4294967168  ;;  %s836_s5 = sand.u32 1, %s3324_s4  }
  0xce   : > { %s837_s21 = scalar_lea.sflag [#allocation6], %s836_s5 }
  0xcf   : > { %3102 = dma.done.wait (%p4022_p1), %s837_s21, 256  }
  0xd0   : > { %3104 = vsyncadd (%p4022_p1), %s837_s21, 4294967040  ;;  %s855_s7 = scalar_lea.sflag [#allocation9], %s836_s5 }
  0xd1   : > { %3106 = dma.done.wait (%p4022_p1), %s855_s7, 128  }
  0xd2   : > { %3108 = vsyncadd (%p4022_p1), %s855_s7, 4294967168  ;;  %p4023_p12 = scmp.eq.s32.totalorder %s3324_s4, 0 }
  0xd4   : > { %3110 = dma.done.wait (%p4023_p12), [#allocation9], 16   ;;  %p4024_p4 = pmov %p4023_p12 }
  0xd5   : > { %p993_p11 = scmp.lt.s32.totalorder %s3135_s3, 1  ;;  %p996_p3 = scmp.lt.s32.totalorder %s3131_s27, 1 }
  0xd6   : > { %3112 = vsyncadd (%p4024_p4), [#allocation9], 4294967280  ;;  %s4026_s19 = sld [smem:[#allocation37_spill]]  ;;  %s4027_s21 = sld [smem:[#allocation38_spill]] }
  0xd7   : > { %s3580_s26 = scalar_select %p993_p11, %s3135_s3, 1 }
  0xd8   : > { %s3583_s16 = scalar_select %p996_p3, %s3131_s27, 1 }
  0xd9   : > { %s4029_s18 = sld [smem:[#allocation40_spill]]  ;;  %s4031_s6 = sld [smem:[#allocation42_spill]] }
  0xda   : > { %s2566_s28 = sshll.u32 %s3583_s16, 4  ;;  %s4033_s29 = sld [smem:[#allocation44_spill]] }
  0xdb   : > { %s4034_s9 = sld [smem:[#allocation45_spill]]  ;;  %s2571_s10 = sshll.u32 %s3583_s16, 6 }
  0xdc   : > { %s3597_s17 = scalar_lea.vmem %s4026_s19, %s2566_s28  ;;  %s3602_s7 = scalar_lea.vmem %s4027_s21, %s2566_s28 }
  0xdd   : > { %s4035_s13 = sld [smem:[#allocation46_spill]]  ;;  %s4036_s24 = sld [smem:[#allocation47_spill]] }
  0xde   : > { %s4037_s25 = sld [smem:[#allocation48_spill]]  ;;  %p2519_p5 = scmp.ne.s32.totalorder %s3131_s27, 0 }
  0xdf   : > { %s3611_s2 = scalar_lea.vmem %s4029_s18, %s2566_s28  ;;  %s3620_s12 = scalar_lea.vmem %s4031_s6, %s2566_s28  ;;  %v3154_v1 = vmov (!%p2519_p5), 0.0   ;;  %vm3155_vm0 = vmmov (!%p2519_p5), 0   ;;  %vm1072_vm1 = vcmask (!%p2519_p5), 130048   ;;  %v2520_v7 = vld [vmem:[#allocation10] ss:$0 sm:$0xff] (!%p2519_p5)  ;;  %vm1127_vm2 = vcmask (!%p2519_p5), 64512  }
  0xe0   : > { %s3629_s4 = scalar_lea.vmem %s4033_s29, %s2566_s28  ;;  %s4038_s29 = sld [smem:[#allocation49_spill]]  ;;  %2614 = vmatprep.subr.bf16.mxu0 (!%p2519_p5), %v3154_v1  ;;  %2616 = vmatprep.mubr.msk.bf16.mxu0 (!%p2519_p5), %vm3155_vm0, %v3154_v1  ;;  %vm1130_vm3 = vcmask (!%p2519_p5), 195584   ;;  %vm1167_vm4 = vcmask (!%p2519_p5), 252928   ;;  %vm1175_vm5 = vcmask (!%p2519_p5), 7168   ;;  %vm1182_vm6 = vcmask (!%p2519_p5), 261120  }
  0xe1   : > { %s1035_s0 = scalar_lea.vmem %s4034_s9, %s3583_s16  ;;  %s3654_s18 = scalar_lea.vmem [#allocation11], %s3553_s15 }
  0xe2   : > { %1054 = sbr.rel (%p2519_p5) target bundleno = 575 (0x23f), region = 128  ;;  %s4039_s9 = sld [smem:[#allocation35_spill]] (!%p2519_p5) }
  0xe3   : > { %s3639_s1 = scalar_lea.vmem %s4035_s13, %s2571_s10  ;;  %s1043_s30 = scalar_lea.vmem %s4036_s24, %s3583_s16 }
  0xe4   : > { %s1046_s11 = scalar_lea.vmem %s4037_s25, %s3583_s16  ;;  %s4040_s24 = scalar_lea.vmem (!%p2519_p5), [#allocation2], %s3553_s15 }
  0xe5   : > { %v1055_v2 = vld [vmem:[%s4040_s24] sm:$0xff] (!%p2519_p5)  ;;  %s4041_s25 = scalar_lea.vmem (!%p2519_p5), [#allocation5], %s3553_s15  ;;  %s3156_s27 = smov (!%p2519_p5), 8  }
  0xe6   : > { %s1049_s3 = scalar_lea.vmem %s4038_s29, %s3583_s16  ;;  %v1116_v3 = vld [vmem:[%s4041_s25] sm:$0xff] (!%p2519_p5)  ;;  %v1056_v4 = vpack.c.bf16 (!%p2519_p5), %v1055_v2, %v1055_v2  ;;  %s3157_s10 = smov (!%p2519_p5), 16  }
  0xe7   : > { %1118 = vrot.lane.b32.xlu0 (!%p2519_p5), %v1116_v3, %s3156_s27  ;;  %1121 = vrot.lane.b32.xlu1 (!%p2519_p5), %v1116_v3, %s3157_s10  ;;  %s4042_s22 = scalar_lea.vmem (!%p2519_p5), [#allocation7], %s3553_s15  ;;  %s3158_s20 = smov (!%p2519_p5), 24  }
  0xe8   : > { %v2850_v0 = vld [vmem:[%s4039_s9] sm:$0xff] (!%p2519_p5)   ;;  %s4043_s6 = scalar_lea.vmem (!%p2519_p5), [#allocation8], %s3553_s15  ;;  %s3159_s19 = smov (!%p2519_p5), 31  }
  0xe9   : > { %2615 = vmatpush3.bf16.msra.mxu0 %v2850_v0  ;;  %v1132_v5 = vld [vmem:[%s4042_s22] sm:$0xff]  ;;  %v1146_v6 = vld [vmem:[%s4043_s6] sm:$0xff]  ;;  %s3160_s5 = smov 127   ;;  %s3161_s21 = smov 1  }
  0xea   : > { %s3162_s28 = smov 97  }
  0xeb   : > { %1134 = vrot.lane.b32.xlu0 %v1132_v5, %s3156_s27  ;;  %1137 = vrot.lane.b32.xlu1 %v1132_v5, %s3157_s10 }
  0xec   : > { %2617 = vmatmul.mubr.msk.bf16.vlgmr.msra.gmra.mrb[0].mxu0 %vm1072_vm1, %v1056_v4 }
  0xef   : > { %1124 = vrot.lane.b32.xlu0 %v1116_v3, %s3158_s20  ;;  %1140 = vrot.lane.b32.xlu1 %v1132_v5, %s3158_s20 }
  0xf3   : > { %1148 = vrot.lane.b32.xlu0 %v1146_v6, %s3156_s27  ;;  %1151 = vrot.lane.b32.xlu1 %v1146_v6, %s3157_s10 }
  0xf7   : > { %1154 = vrot.lane.b32.xlu0 %v1146_v6, %s3158_s20 }
 0x159   : > { %v1119_v13 = vpop.permute.xlu0 %1118  ;;  %v1122_v15 = vpop.permute.xlu1 %1121 }
 0x15a   : > { %v1128_v20 = vsel %vm1127_vm2, %v1116_v3, %v1119_v13 }
 0x15b   : > { %v1129_v24 = vsel %vm1072_vm1, %v1128_v20, %v1122_v15 }
 0x15d   : > { %v1135_v14 = vpop.permute.xlu0 %1134  ;;  %v1138_v17 = vpop.permute.xlu1 %1137 }
 0x15e   : > { %v1143_v21 = vsel %vm1127_vm2, %v1132_v5, %v1135_v14 }
 0x15f   : > { %v1144_v25 = vsel %vm1072_vm1, %v1143_v21, %v1138_v17 }
 0x161   : > { %v1125_v16 = vpop.permute.xlu0 %1124  ;;  %v1141_v19 = vpop.permute.xlu1 %1140 }
 0x162   : > { %v1131_v29 = vsel %vm1130_vm3, %v1129_v24, %v1125_v16  ;;  %v1145_v30 = vsel %vm1130_vm3, %v1144_v25, %v1141_v19 }
 0x165   : > { %v1149_v18 = vpop.permute.xlu0 %1148  ;;  %v1152_v22 = vpop.permute.xlu1 %1151 }
 0x166   : > { %v1157_v26 = vsel %vm1127_vm2, %v1146_v6, %v1149_v18 }
 0x167   : > { %v1158_v32 = vsel %vm1072_vm1, %v1157_v26, %v1152_v22 }
 0x169   : > { %v1155_v23 = vpop.permute.xlu0 %1154 }
 0x16a   : > { %v1159_v37 = vsel %vm1130_vm3, %v1158_v32, %v1155_v23 }
 0x1bf   : > { %v1110_v8 = vpop.f32.mrb[0].mxu0 }
 0x1c0   : > { %v1111_v9 = vadd.f32 %v2520_v7, %v1110_v8  ;;  %v2618_v10 = vpop.f32.mrb[1].mxu0 }
 0x1c1   : > { %v1113_v11 = vpop.f32.mrb[2].mxu0 }
 0x1c2   : > { %1164 = vrot.lane.b32.xlu0 %v1111_v9, %s3159_s19  ;;  %1161 = vrot.lane.b32.xlu1 %v1111_v9, %s3160_s5  ;;  %v2619_v12 = vpop.f32.mrb[3].mxu0  ;;  %v1177_v34 = vmul.f32 %v1131_v29, %v1111_v9 }
 0x1c6   : > { %1172 = vrot.lane.b32.xlu0 %v1111_v9, %s3161_s21  ;;  %1169 = vrot.lane.b32.xlu1 %v1111_v9, %s3162_s28 }
 0x234   : > { %v1165_v27 = vpop.permute.xlu0 %1164  ;;  %v1162_v28 = vpop.permute.xlu1 %1161 }
 0x235   : > { %v1168_v31 = vsel %vm1167_vm4, %v1162_v28, %v1165_v27 }
 0x236   : > { %v1178_v33 = vmul.f32 %v1168_v31, %v1145_v30 }
 0x238   : > { %v1173_v35 = vpop.permute.xlu0 %1172  ;;  %v1170_v36 = vpop.permute.xlu1 %1169  ;;  %v1179_v39 = vadd.f32 %v1178_v33, %v1177_v34 }
 0x239   : > { %v1176_v38 = vsel %vm1175_vm5, %v1170_v36, %v1173_v35 }
 0x23a   : > { %v1180_v40 = vmul.f32 %v1176_v38, %v1159_v37 }
 0x23c   : > { %v1181_v41 = vadd.f32 %v1180_v40, %v1179_v39 }
 0x23e   : > { %1183 = vst.msk [vmem:[%s3654_s18] sm:$0xff] %vm1182_vm6, %v1181_v41 }
 0x23f PF: > { %v2851_v42 = vld [vmem:[%s3597_s17] sm:$0xff]   ;;  %v3163_v43 = vmov 0.0   ;;  %v2852_v44 = vld [vmem:[%s3597_s17 + $0x8] sm:$0xff]   ;;  %vm3164_vm7 = vmmov 0   ;;  %vm1210_vm8 = vcmask 261120   ;;  %s4045_s14 = sld [smem:[#allocation39_spill]]  ;;  %v1606_v26 = vlaneseq }
 0x240   : > { %2620 = vmatprep.subr.bf16.mxu0 %v3163_v43  ;;  %2644 = vmatprep.subr.bf16.mxu1 %v3163_v43  ;;  %v2853_v46 = vld [vmem:[%s3602_s7] sm:$0xff]   ;;  %v2854_v48 = vld [vmem:[%s3602_s7 + $0x8] sm:$0xff]   ;;  %s4044_s7 = scalar_lea.vmem %s3919_s8, %s3583_s16  ;;  %vm1419_vm9 = vcmask 64512   ;;  %s3166_s9 = smov 104   ;;  %vm1670_vm10 = vcmask 1043456   ;;  %v3168_v30 = vmov 0  }
 0x241   : > { %2621 = vmatpush3.bf16.msra.mxu0 %v2851_v42  ;;  %2624 = vmatprep.mubr.msk.bf16.mxu0 %vm3164_vm7, %v3163_v43  ;;  %v2855_v49 = vld [vmem:[%s3611_s2] sm:$0xff]   ;;  %v2856_v50 = vld [vmem:[%s3611_s2 + $0x8] sm:$0xff]   ;;  %s3165_s2 = smov 120   ;;  %s3167_s24 = smov 112   ;;  %v1607_v28 = vshrl.u32 %v1606_v26, 7  ;;  %vm1865_vm13 = vcmask 130048  }
 0x242   : > { %2622 = vmatprep.subr.bf16.mxu0 %v3163_v43  ;;  %2646 = vmatprep.mubr.msk.bf16.mxu1 %vm3164_vm7, %v3163_v43  ;;  %v2523_v51 = vld [vmem:[%s4044_s7] ss:$0 sm:$0xff]  ;;  %s4047_s10 = sld [smem:[#allocation41_spill]]  ;;  %s4049_s19 = sld [smem:[#allocation34_spill]]  ;;  %vm1867_vm14 = vcmask 195584  }
 0x243   : > { %v1608_v29 = vsub.s32 0, %v1607_v28  ;;  %s3170_s21 = smov 16   ;;  %s3171_s28 = smov 24  }
 0x244   : > { %s4051_s17 = sld [smem:[#allocation43_spill]]  ;;  %s4060_s6 = sld [smem:[#allocation50_spill]] }
 0x245   : > { %v3680_v45 = vld [vmem:[%s3654_s18] sm:$0xff]  ;;  %2623 = vmatpush3.bf16.msra.mxu0 %v2852_v44  ;;  %s4046_s13 = scalar_lea.vmem %s4045_s14, %s3583_s16 }
 0x246   : > { %v1186_v47 = vpack.c.bf16 %v3680_v45, %v3680_v45  ;;  %2628 = vmatprep.subr.bf16.mxu0 %v3163_v43  ;;  %v2527_v58 = vld [vmem:[%s4046_s13] ss:$0 sm:$0xff] }
 0x248   : > { %2625 = vmatmul.mubr.msk.bf16.vlgmr.msra.gmra.mrb[0].mxu0 %vm1210_vm8, %v1186_v47  ;;  %s4048_s22 = scalar_lea.vmem %s4047_s10, %s3583_s16  ;;  %s4050_s5 = scalar_lea.vmem %s4049_s19, %s3580_s26 }
 0x249   : > { %2629 = vmatpush3.bf16.msra.mxu0 %v2853_v46  ;;  %2632 = vmatprep.mubr.msk.bf16.mxu0 %vm3164_vm7, %v3163_v43  ;;  %v2531_v18 = vld [vmem:[%s4048_s22] ss:$0 sm:$0xff]  ;;  %s3169_s26 = smov 8   ;;  %s2178_s10 = sshll.u32 %s3654_s18, 4  ;;  %s3857_s10 = int_to_ptr.vmem [resolvable:$true] %s2178_s10 }
 0x24a   : > { %2630 = vmatprep.subr.bf16.mxu0 %v3163_v43  ;;  %v1185_v27 = vld [vmem:[%s4050_s5] sm:$0x1]  ;;  %s4052_s7 = scalar_lea.vmem %s4051_s17, %s3583_s16  ;;  %s4059_s16 = sld [smem:[#allocation24_spill]] }
 0x24b   : > { %vm1604_vm11 = vcmp.gt.s32.totalorder %v1185_v27, 0 }
 0x24c   : > { %v1605_v31 = vsel %vm1604_vm11, 1, %v3168_v30 }
 0x24d   : > { %2631 = vmatpush3.bf16.msra.mxu0 %v2854_v48  ;;  %v1609_v32 = vrot.slane %v1605_v31, %v1608_v29 }
 0x24e   : > { %2636 = vmatprep.subr.bf16.mxu0 %v3163_v43 }
 0x24f   : > { %vm1610_vm12 = vcmp.eq.s32.totalorder %v1609_v32, 1 }
 0x250   : > { %2633 = vmatmul.mubr.msk.bf16.vlgmr.msra.gmra.mrb[4].mxu0 %vm1210_vm8, %v1186_v47  ;;  %p4061_p7 = scmp.ne.s32.totalorder %s4059_s16, 0 }
 0x251   : > { %2640 = vmatprep.mubr.msk.bf16.mxu0 %vm3164_vm7, %v3163_v43  ;;  %2637 = vmatpush3.bf16.msra.mxu0 %v2855_v49 }
 0x252   : > { %2638 = vmatprep.subr.bf16.mxu0 %v3163_v43 }
 0x255   : > { %2639 = vmatpush3.bf16.msra.mxu0 %v2856_v50 }
 0x256   : > { %2650 = vmatprep.subr.bf16.mxu0 %v3163_v43 }
 0x258   : > { %2641 = vmatmul.mubr.msk.bf16.vlgmr.msra.gmra.mrb[8].mxu0 %vm1210_vm8, %v1186_v47 }
 0x259   : > { %2652 = vmatprep.mubr.msk.bf16.mxu0 %vm3164_vm7, %v3163_v43 }
 0x31b   : > { %v1248_v52 = vpop.f32.mrb[0].mxu0 }
 0x31c   : > { %v1249_v53 = vadd.f32 %v2523_v51, %v1248_v52  ;;  %v2626_v54 = vpop.f32.mrb[1].mxu0 }
 0x31d   : > { %v1251_v55 = vpop.f32.mrb[2].mxu0 }
 0x31e   : > { %v1380_v56 = vmul.f32 0.35355338, %v1249_v53  ;;  %v2627_v57 = vpop.f32.mrb[3].mxu0 }
 0x320   : > { %1382 = vrot.lane.b32.xlu1 %v1380_v56, %s3165_s2  ;;  %v1411_v2 = vpack.c.bf16 %v1380_v56, %v1380_v56 }
 0x323   : > { %v1311_v59 = vpop.f32.mrb[4].mxu0 }
 0x324   : > { %v1312_v60 = vadd.f32 %v2527_v58, %v1311_v59  ;;  %v2634_v61 = vpop.f32.mrb[5].mxu0 }
 0x325   : > { %v1314_v62 = vpop.f32.mrb[6].mxu0 }
 0x326   : > { %1398 = vrot.lane.b32.xlu1 %v1312_v60, %s3166_s9  ;;  %1392 = vrot.lane.b32.xlu0 %v1312_v60, %s3165_s2  ;;  %v2635_v63 = vpop.f32.mrb[7].mxu0  ;;  %v1415_v0 = vpack.c.bf16 %v1312_v60, %v1312_v60 }
 0x328   : > { %v1424_v1 = vsel %vm1419_vm9, %v1415_v0, 0 }
 0x329   : > { %2645 = vmatpush3.bf16.xpose.msra.mxu1 %v1424_v1 }
 0x32a   : > { %1388 = vrot.lane.b32.xlu1 %v1380_v56, %s3166_s9  ;;  %1395 = vrot.lane.b32.xlu0 %v1312_v60, %s3167_s24 }
 0x32b   : > { %2656 = vmatprep.subr.bf16.mxu1 %v3163_v43  ;;  %v1374_v19 = vpop.f32.mrb[8].mxu0 }
 0x32c   : > { %v3746_v20 = vadd.f32 %v2531_v18, %v1374_v19  ;;  %v2642_v21 = vpop.f32.mrb[9].mxu0 }
 0x32d   : > { %v1377_v22 = vpop.f32.mrb[10].mxu0 }
 0x32e   : > { %1385 = vrot.lane.b32.xlu0 %v1380_v56, %s3167_s24  ;;  %v2643_v23 = vpop.f32.mrb[11].mxu0  ;;  %v1663_v24 = vpack.c.bf16 %v3746_v20, %v3746_v20 }
 0x330   : > { %2647 = vmatmul.mubr.msk.bf16.vlgmr.msra.gmra.mrb[0].mxu1 %vm1419_vm9, %v1411_v2  ;;  %v1672_v25 = vsel %vm1670_vm10, %v1663_v24, 0 }
 0x331   : > { %2658 = vmatprep.mubr.msk.bf16.mxu1 %vm3164_vm7, %v3163_v43 }
 0x392   : > { %v1383_v3 = vpop.permute.xlu1 %1382 }
 0x393   : > { %v1412_v12 = vpack.c.bf16 %v1383_v3, %v1383_v3 }
 0x398   : > { %v1393_v4 = vpop.permute.xlu0 %1392  ;;  %v1399_v7 = vpop.permute.xlu1 %1398 }
 0x399   : > { %v1416_v5 = vpack.c.bf16 %v1393_v4, %v1393_v4  ;;  %v1418_v10 = vpack.c.bf16 %v1399_v7, %v1399_v7 }
 0x39b   : > { %v1470_v6 = vsel %vm1419_vm9, %v1416_v5, 0  ;;  %v1562_v14 = vsel %vm1419_vm9, %v1418_v10, 0 }
 0x39c   : > { %2651 = vmatpush3.bf16.xpose.msra.mxu0 %v1470_v6  ;;  %v1396_v8 = vpop.permute.xlu0 %1395  ;;  %v1389_v16 = vpop.permute.xlu1 %1388 }
 0x39d   : > { %v1417_v9 = vpack.c.bf16 %v1396_v8, %v1396_v8  ;;  %2662 = vmatprep.subr.bf16.mxu0 %v3163_v43  ;;  %v1414_v17 = vpack.c.bf16 %v1389_v16, %v1389_v16 }
 0x39f   : > { %v1516_v11 = vsel %vm1419_vm9, %v1417_v9, 0 }
 0x3a0   : > { %2657 = vmatpush3.bf16.xpose.msra.mxu1 %v1516_v11  ;;  %v1386_v13 = vpop.permute.xlu0 %1385 }
 0x3a1   : > { %2668 = vmatprep.subr.bf16.mxu1 %v3163_v43  ;;  %v1413_v15 = vpack.c.bf16 %v1386_v13, %v1386_v13 }
 0x3a3   : > { %2653 = vmatmul.mubr.msk.bf16.vlgmr.msra.gmra.mrb[12].mxu0 %vm1419_vm9, %v1412_v12 }
 0x3a4   : > { %2663 = vmatpush3.bf16.xpose.msra.mxu0 %v1562_v14  ;;  %2664 = vmatprep.mubr.msk.bf16.mxu0 %vm3164_vm7, %v3163_v43 }
 0x3a5   : > { %2674 = vmatprep.subr.bf16.mxu0 %v3163_v43 }
 0x3a7   : > { %2659 = vmatmul.mubr.msk.bf16.vlgmr.msra.gmra.mrb[4].mxu1 %vm1419_vm9, %v1413_v15 }
 0x3a8   : > { %2670 = vmatprep.mubr.msk.bf16.mxu1 %vm3164_vm7, %v3163_v43  ;;  %2669 = vmatpush3.bf16.msra.mxu1 %v1672_v25 }
 0x3a9   : > { %2680 = vmatprep.subr.bf16.mxu1 %v3163_v43 }
 0x3ab   : > { %2665 = vmatmul.mubr.msk.bf16.vlgmr.msra.gmra.mrb[16].mxu0 %vm1419_vm9, %v1414_v17 }
 0x3ac   : > { %2676 = vmatprep.mubr.msk.bf16.mxu0 %vm3164_vm7, %v3163_v43 }
 0x403   : > { %v1460_v33 = vpop.f32.mrb[0].mxu1 }
 0x404   : > { %v1611_v34 = vsel %vm1610_vm12, -inf, %v1460_v33  ;;  %v2648_v35 = vpop.f32.mrb[1].mxu1 }
 0x405   : > { %v1463_v36 = vpop.f32.mrb[2].mxu1  ;;  %v1615_v37 = vsel %vm1419_vm9, %v1611_v34, -inf }
 0x406   : > { %1616 = vmax.xlane.f32.xlu0 %v1615_v37  ;;  %v2649_v38 = vpop.f32.mrb[3].mxu1 }
 0x476   : > { %v1506_v39 = vpop.f32.mrb[12].mxu0 }
 0x477   : > { %v1612_v40 = vsel %vm1610_vm12, -inf, %v1506_v39  ;;  %v2654_v41 = vpop.f32.mrb[13].mxu0 }
 0x478   : > { %v1509_v42 = vpop.f32.mrb[14].mxu0  ;;  %v1618_v44 = vsel %vm1419_vm9, %v1612_v40, -inf }
 0x479   : > { %1619 = vmax.xlane.f32.xlu1 %v1618_v44  ;;  %v2655_v46 = vpop.f32.mrb[15].mxu0 }
 0x47a   : > { %v1552_v47 = vpop.f32.mrb[4].mxu1  ;;  %v2857_v46 = vld [vmem:[%s3620_s12] sm:$0xff]  }
 0x47b   : > { %v1613_v48 = vsel %vm1610_vm12, -inf, %v1552_v47  ;;  %v2660_v49 = vpop.f32.mrb[5].mxu1  ;;  %v2858_v47 = vld [vmem:[%s3620_s12 + $0x8] sm:$0xff]  }
 0x47c   : > { %v1555_v50 = vpop.f32.mrb[6].mxu1  ;;  %v1621_v51 = vsel %vm1419_vm9, %v1613_v48, -inf }
 0x47d   : > { %1622 = vmax.xlane.f32.xlu0 %v1621_v51  ;;  %v2661_v52 = vpop.f32.mrb[7].mxu1 }
 0x47e   : > { %v1598_v53 = vpop.f32.mrb[16].mxu0 }
 0x47f   : > { %v1614_v54 = vsel %vm1610_vm12, -inf, %v1598_v53  ;;  %v2666_v55 = vpop.f32.mrb[17].mxu0 }
 0x480   : > { %v1601_v56 = vpop.f32.mrb[18].mxu0  ;;  %v1624_v57 = vsel %vm1419_vm9, %v1614_v54, -inf }
 0x481   : > { %1625 = vmax.xlane.f32.xlu0 %v1624_v57  ;;  %v2667_v58 = vpop.f32.mrb[19].mxu0 }
 0x48a   : > { %1402 = vrot.lane.b32.xlu1 %v3746_v20, %s3165_s2 }
 0x493   : > { %v1617_v59 = vpop.xlane.xlu0 %1616 }
 0x494   : > { %v1627_v60 = vsub.f32 %v1611_v34, %v1617_v59 }
 0x496   : > { %v1631_v61 = vmul.f32 1.442695, %v1627_v60 }
 0x498   : > { %2869 = vpow2.f32 %v1631_v61 }
 0x4a2   : > { %v2870_v62 = vpop.eup %2869 }
 0x4a3   : > { %v1639_v63 = vsel %vm1419_vm9, %v2870_v62, 0.0 }
 0x4ae   : > { %1640 = vadd.xlane.f32.xlu1 %v1639_v63 }
 0x506   : > { %v1620_v0 = vpop.xlane.xlu1 %1619 }
 0x507   : > { %v1628_v1 = vsub.f32 %v1612_v40, %v1620_v0 }
 0x509   : > { %v1633_v2 = vmul.f32 1.442695, %v1628_v1 }
 0x50a   : > { %v1623_v3 = vpop.xlane.xlu0 %1622  ;;  %v1403_v4 = vpop.permute.xlu1 %1402 }
 0x50b   : > { %2871 = vpow2.f32 %v1633_v2  ;;  %v1629_v5 = vsub.f32 %v1613_v48, %v1623_v3  ;;  %v1664_v6 = vpack.c.bf16 %v1403_v4, %v1403_v4  ;;  %v2543_v3 = vld [vmem:[%s4052_s7] ss:$0 sm:$0xff] }
 0x50d   : > { %v1635_v7 = vmul.f32 1.442695, %v1629_v5  ;;  %v1718_v8 = vsel %vm1670_vm10, %v1664_v6, 0 }
 0x50e   : > { %2675 = vmatpush3.bf16.msra.mxu0 %v1718_v8  ;;  %v1626_v9 = vpop.xlane.xlu0 %1625 }
 0x50f   : > { %2873 = vpow2.f32 %v1635_v7  ;;  %v1630_v10 = vsub.f32 %v1614_v54, %v1626_v9  ;;  %2686 = vmatprep.subr.bf16.mxu0 %v3163_v43 }
 0x511   : > { %v1637_v11 = vmul.f32 1.442695, %v1630_v10 }
 0x513   : > { %2875 = vpow2.f32 %v1637_v11 }
 0x515   : > { %v2872_v12 = vpop.eup %2871 }
 0x516   : > { %v1642_v13 = vsel %vm1419_vm9, %v2872_v12, 0.0 }
 0x517   : > { %1643 = vadd.xlane.f32.xlu0 %v1642_v13 }
 0x519   : > { %v2874_v14 = vpop.eup %2873 }
 0x51a   : > { %v1645_v15 = vsel %vm1419_vm9, %v2874_v14, 0.0 }
 0x51b   : > { %1646 = vadd.xlane.f32.xlu1 %v1645_v15 }
 0x51d   : > { %v2876_v16 = vpop.eup %2875 }
 0x51e   : > { %v1648_v17 = vsel %vm1419_vm9, %v2876_v16, 0.0 }
 0x51f   : > { %1649 = vadd.xlane.f32.xlu0 %v1648_v17  ;;  %v2860_v17 = vld [vmem:[%s3629_s4 + $0x8] sm:$0xff]  }
 0x52c   : > { %1408 = vrot.lane.b32.xlu1 %v3746_v20, %s3166_s9 }
 0x535   : > { %1405 = vrot.lane.b32.xlu0 %v3746_v20, %s3167_s24 }
 0x53b   : > { %v1641_v18 = vpop.xlane.xlu1 %1640 }
 0x53c   : > { %2877 = vrcp.f32 %v1641_v18  ;;  %v2862_v18 = vld [vmem:[%s3639_s1 + $0x8] sm:$0xff]  }
 0x546   : > { %v2878_v19 = vpop.eup %2877 }
 0x547   : > { %v1655_v21 = vmul.f32 %v2878_v19, %v2870_v62  ;;  %v2863_v19 = vld [vmem:[%s3639_s1 + $0x10] sm:$0xff]  }
 0x549   : > { %v1659_v22 = vpack.c.bf16 %v1655_v21, %v1655_v21  ;;  %v2864_v21 = vld [vmem:[%s3639_s1 + $0x18] sm:$0xff]  }
 0x54b   : > { %2671 = vmatmul.mubr.msk.bf16.vlgmr.msra.gmra.mrb[8].mxu1 %vm1419_vm9, %v1659_v22  ;;  %v2865_v22 = vld [vmem:[%s3639_s1 + $0x20] sm:$0xff]  }
 0x54c   : > { %2682 = vmatprep.mubr.msk.bf16.mxu1 %vm3164_vm7, %v3163_v43 }
 0x5a4   : > { %v1644_v23 = vpop.xlane.xlu0 %1643 }
 0x5a5   : > { %2879 = vrcp.f32 %v1644_v23  ;;  %v2866_v23 = vld [vmem:[%s3639_s1 + $0x28] sm:$0xff]  }
 0x5a8   : > { %v1647_v24 = vpop.xlane.xlu1 %1646 }
 0x5a9   : > { %2881 = vrcp.f32 %v1647_v24 }
 0x5ac   : > { %v1650_v25 = vpop.xlane.xlu0 %1649  ;;  %v1409_v26 = vpop.permute.xlu1 %1408 }
 0x5ad   : > { %2883 = vrcp.f32 %v1650_v25  ;;  %v1666_v20 = vpack.c.bf16 %v1409_v26, %v1409_v26 }
 0x5af   : > { %v2880_v27 = vpop.eup %2879  ;;  %v1810_v35 = vsel %vm1670_vm10, %v1666_v20, 0 }
 0x5b0   : > { %v1656_v28 = vmul.f32 %v2880_v27, %v2872_v12  ;;  %v1406_v29 = vpop.permute.xlu0 %1405 }
 0x5b1   : > { %v1665_v30 = vpack.c.bf16 %v1406_v29, %v1406_v29  ;;  %v2548_v29 = vld [vmem:[%s1049_s3] ss:$0 sm:$0xff] }
 0x5b2   : > { %v1660_v31 = vpack.c.bf16 %v1656_v28, %v1656_v28  ;;  %v2547_v28 = vld [vmem:[%s1046_s11] ss:$0 sm:$0xff] }
 0x5b3   : > { %v2882_v32 = vpop.eup %2881  ;;  %v1764_v33 = vsel %vm1670_vm10, %v1665_v30, 0 }
 0x5b4   : > { %v1657_v34 = vmul.f32 %v2882_v32, %v2874_v14  ;;  %2677 = vmatmul.mubr.msk.bf16.vlgmr.msra.gmra.mrb[20].mxu0 %vm1419_vm9, %v1660_v31  ;;  %2681 = vmatpush3.bf16.msra.mxu1 %v1764_v33  ;;  %v2867_v33 = vld [vmem:[%s3639_s1 + $0x30] sm:$0xff]  }
 0x5b5   : > { %2687 = vmatpush3.bf16.msra.mxu0 %v1810_v35  ;;  %2688 = vmatprep.mubr.msk.bf16.mxu0 %vm3164_vm7, %v3163_v43  ;;  %v2549_v35 = vld [vmem:[%s1035_s0] ss:$0 sm:$0xff]  ;;  %s4058_s0 = sld [smem:[#allocation29_spill]] }
 0x5b6   : > { %v1661_v36 = vpack.c.bf16 %v1657_v34, %v1657_v34  ;;  %2692 = vmatprep.subr.bf16.mxu1 %v3163_v43  ;;  %2700 = vmatprep.subr.bf16.mxu0 %v3163_v43  ;;  %v2868_v34 = vld [vmem:[%s3639_s1 + $0x38] sm:$0xff]  }
 0x5b7   : > { %v2884_v37 = vpop.eup %2883 }
 0x5b8   : > { %v1658_v38 = vmul.f32 %v2884_v37, %v2876_v16  ;;  %2683 = vmatmul.mubr.msk.bf16.vlgmr.msra.gmra.mrb[12].mxu1 %vm1419_vm9, %v1661_v36  ;;  %v2859_v16 = vld [vmem:[%s3629_s4] sm:$0xff]  }
 0x5b9   : > { %2696 = vmatprep.mubr.msk.bf16.mxu1 %vm3164_vm7, %v3163_v43  ;;  %2693 = vmatpush3.bf16.msra.mxu1 %v2857_v46 }
 0x5ba   : > { %v1662_v39 = vpack.c.bf16 %v1658_v38, %v1658_v38  ;;  %2694 = vmatprep.subr.bf16.mxu1 %v3163_v43 }
 0x5bb   : > { %s2165_s5 = scalar_lea.sflag [#allocation4], %s4058_s0 }
 0x5bc   : > { %2689 = vmatmul.mubr.msk.bf16.vlgmr.msra.gmra.mrb[24].mxu0 %vm1419_vm9, %v1662_v39 }
 0x5bd   : > { %2704 = vmatprep.mubr.msk.bf16.mxu0 %vm3164_vm7, %v3163_v43  ;;  %2695 = vmatpush3.bf16.msra.mxu1 %v2858_v47 }
 0x5be   : > { %2708 = vmatprep.subr.bf16.mxu1 %v3163_v43  ;;  %2701 = vmatpush3.bf16.msra.mxu0 %v2859_v16 }
 0x5bf   : > { %2702 = vmatprep.subr.bf16.mxu0 %v3163_v43 }
 0x5c2   : > { %2703 = vmatpush3.bf16.msra.mxu0 %v2860_v17 }
 0x61e   : > { %v1708_v40 = vpop.f32.mrb[8].mxu1 }
 0x61f   : > { %v2672_v41 = vpop.f32.mrb[9].mxu1 }
 0x620   : > { %v1711_v42 = vpop.f32.mrb[10].mxu1 }
 0x621   : > { %v2673_v44 = vpop.f32.mrb[11].mxu1 }
 0x687   : > { %v1754_v48 = vpop.f32.mrb[20].mxu0 }
 0x688   : > { %1853 = vrot.lane.b32.xlu1 %v1754_v48, %s3169_s26  ;;  %v2678_v49 = vpop.f32.mrb[21].mxu0  ;;  %s3037_s26 = scalar_lea.vmem %s3857_s10, 128 }
 0x689   : > { %v1757_v50 = vpop.f32.mrb[22].mxu0  ;;  %p3038_p13 = scmp.ne.s32.totalorder %s3857_s10, %s3037_s26 }
 0x68a   : > { %v2679_v51 = vpop.f32.mrb[23].mxu0 }
 0x68b   : > { %v1800_v52 = vpop.f32.mrb[12].mxu1  ;;  %p3039_p0 = pnand %p3038_p13, %p4061_p7 }
 0x68c   : > { %1857 = vrot.lane.b32.xlu0 %v1800_v52, %s3170_s21  ;;  %v2684_v53 = vpop.f32.mrb[13].mxu1  ;;  %s3172_s21 = smov [#allocation11]  }
 0x68d   : > { %v1803_v54 = vpop.f32.mrb[14].mxu1  ;;  %p3040_p9 = pneg %p3039_p0 }
 0x68e   : > { %v2685_v55 = vpop.f32.mrb[15].mxu1 }
 0x68f   : > { %v1846_v56 = vpop.f32.mrb[24].mxu0 }
 0x690   : > { %1861 = vrot.lane.b32.xlu1 %v1846_v56, %s3171_s28  ;;  %v2690_v57 = vpop.f32.mrb[25].mxu0  ;;  %s3041_s28 = sshll.u32 %s3172_s21, 4  ;;  %s3042_s28 = int_to_ptr.vmem [resolvable:$false] %s3041_s28 }
 0x691   : > { %v1849_v58 = vpop.f32.mrb[26].mxu0  ;;  %s3043_s12 = scalar_lea.vmem %s3042_s28, 256  ;;  %p3044_p8 = scmp.lt.s32.totalorder %s3857_s10, %s3042_s28 }
 0x692   : > { %v2691_v59 = vpop.f32.mrb[27].mxu0  ;;  %p3045_p6 = scmp.lt.s32.totalorder %s3043_s12, %s3037_s26 }
 0x694   : > { %p3046_p10 = por %p3045_p6, %p3044_p8 }
 0x696   : > { %p3047_p2 = pnand %p3046_p10, %p3040_p9 }
 0x6fa   : > { %v1854_v60 = vpop.permute.xlu1 %1853 }
 0x6fb   : > { %v1864_v62 = vsel %vm1419_vm9, %v1708_v40, %v1854_v60 }
 0x6fe   : > { %v1858_v61 = vpop.permute.xlu0 %1857 }
 0x6ff   : > { %v1866_v63 = vsel %vm1865_vm13, %v1864_v62, %v1858_v61 }
 0x702   : > { %v1862_v0 = vpop.permute.xlu1 %1861 }
 0x703   : > { %v1868_v1 = vsel %vm1867_vm14, %v1866_v63, %v1862_v0 }
 0x704   : > { %v1869_v2 = vpack.c.bf16 %v1868_v1, %v1868_v1 }
 0x706   : > { %2697 = vmatmul.mubr.msk.bf16.vlgmr.msra.gmra.mrb[16].mxu1 %vm1210_vm8, %v1869_v2 }
 0x707   : > { %2724 = vmatprep.mubr.msk.bf16.mxu1 %vm3164_vm7, %v3163_v43 }
 0x7d9   : > { %v1930_v4 = vpop.f32.mrb[16].mxu1 }
 0x7da   : > { %v1931_v5 = vadd.f32 %v2543_v3, %v1930_v4  ;;  %v2698_v6 = vpop.f32.mrb[17].mxu1 }
 0x7db   : > { %v1933_v7 = vpop.f32.mrb[18].mxu1 }
 0x7dc   : > { %v2699_v8 = vpop.f32.mrb[19].mxu1  ;;  %v1938_v9 = vadd.f32 %v1931_v5, %v3680_v45  ;;  %v2861_v45 = vld [vmem:[%s3639_s1] sm:$0xff]   ;;  %s4057_s1 = sld [smem:[#allocation20_spill]] }
 0x7dd   : > { %2709 = vmatpush3.bf16.msra.mxu1 %v2861_v45 }
 0x7de   : > { %v1939_v10 = vsel %vm1210_vm8, %v1938_v9, 0.0  ;;  %2710 = vmatprep.subr.bf16.mxu1 %v3163_v43 }
 0x7df   : > { %1940 = vadd.xlane.f32.xlu0 %v1939_v10 }
 0x7e1   : > { %2711 = vmatpush3.bf16.msra.mxu1 %v2862_v18 }
 0x7e2   : > { %2712 = vmatprep.subr.bf16.mxu1 %v3163_v43 }
 0x7e5   : > { %2713 = vmatpush3.bf16.msra.mxu1 %v2863_v19 }
 0x7e6   : > { %2714 = vmatprep.subr.bf16.mxu1 %v3163_v43 }
 0x7e9   : > { %2715 = vmatpush3.bf16.msra.mxu1 %v2864_v21 }
 0x7ea   : > { %2716 = vmatprep.subr.bf16.mxu1 %v3163_v43 }
 0x7ed   : > { %2717 = vmatpush3.bf16.msra.mxu1 %v2865_v22 }
 0x7ee   : > { %2718 = vmatprep.subr.bf16.mxu1 %v3163_v43 }
 0x7f1   : > { %2719 = vmatpush3.bf16.msra.mxu1 %v2866_v23 }
 0x7f2   : > { %2720 = vmatprep.subr.bf16.mxu1 %v3163_v43 }
 0x7f5   : > { %2721 = vmatpush3.bf16.msra.mxu1 %v2867_v33 }
 0x7f6   : > { %2722 = vmatprep.subr.bf16.mxu1 %v3163_v43  ;;  %v2553_v43 = vld [vmem:[%s1043_s30] ss:$0 sm:$0xff]  ;;  %s2563_s30 = sshll.u32 %s4057_s1, 7 }
 0x7f7   : > { %s3855_s19 = scalar_lea.hbm %s4060_s6, %s2563_s30 }
 0x7f9   : > { %2723 = vmatpush3.bf16.msra.mxu1 %v2868_v34 }
 0x86c   : > { %v1941_v11 = vpop.xlane.xlu0 %1940 }
 0x86d   : > { %v1943_v12 = vmul.f32 0.03125, %v1941_v11 }
 0x86f   : > { %v1944_v13 = vsub.f32 %v1938_v9, %v1943_v12 }
 0x871   : > { %v1945_v14 = vmul.f32 %v1944_v13, %v1944_v13 }
 0x873   : > { %v1946_v15 = vsel %vm1210_vm8, %v1945_v14, 0.0 }
 0x874   : > { %1947 = vadd.xlane.f32.xlu1 %v1946_v15 }
 0x901   : > { %v1948_v24 = vpop.xlane.xlu1 %1947 }
 0x902   : > { %v1949_v25 = vmul.f32 0.03125, %v1948_v24 }
 0x904   : > { %v1950_v26 = vadd.f32 1e-05, %v1949_v25 }
 0x906   : > { %2885 = vrsqrt.f32 %v1950_v26 }
 0x910   : > { %v2886_v27 = vpop.eup %2885 }
 0x911   : > { %v1952_v20 = vmul.f32 %v2886_v27, %v1944_v13 }
 0x913   : > { %v1959_v30 = vmul.f32 %v2547_v28, %v1952_v20 }
 0x915   : > { %v1966_v31 = vadd.f32 %v2548_v29, %v1959_v30 }
 0x917   : > { %v1967_v32 = vpack.c.bf16 %v1966_v31, %v1966_v31 }
 0x919   : > { %2705 = vmatmul.mubr.msk.bf16.vlgmr.msra.gmra.mrb[28].mxu0 %vm1210_vm8, %v1967_v32 }
 0x9ec   : > { %v2028_v36 = vpop.f32.mrb[28].mxu0 }
 0x9ed   : > { %v2029_v37 = vadd.f32 %v2549_v35, %v2028_v36  ;;  %v2706_v38 = vpop.f32.mrb[29].mxu0 }
 0x9ee   : > { %v2031_v39 = vpop.f32.mrb[30].mxu0 }
 0x9ef   : > { %v2034_v40 = vmax.f32 %v2029_v37, 0.0  ;;  %v2707_v41 = vpop.f32.mrb[31].mxu0 }
 0x9f1   : > { %v2035_v42 = vpack.c.bf16 %v2034_v40, %v2034_v40 }
 0x9f3   : > { %2725 = vmatmul.mubr.bf16.vlgmr.msra.gmra.mrb[20].mxu1 %v2035_v42 }
 0xac6   : > { %v2141_v44 = vpop.f32.mrb[20].mxu1 }
 0xac7   : > { %v2142_v46 = vadd.f32 %v2553_v43, %v2141_v44  ;;  %v2726_v47 = vpop.f32.mrb[21].mxu1 }
 0xac8   : > { %v2144_v48 = vpop.f32.mrb[22].mxu1 }
 0xac9   : > { %v2727_v49 = vpop.f32.mrb[23].mxu1  ;;  %v2147_v50 = vadd.f32 %v2142_v46, %v1966_v31 }
 0xacb   : > { %v2148_v51 = vsel %vm1210_vm8, %v2147_v50, 0.0 }
 0xacc   : > { %2149 = vadd.xlane.f32.xlu0 %v2148_v51 }
 0xb59   : > { %v2150_v52 = vpop.xlane.xlu0 %2149 }
 0xb5a   : > { %v2151_v53 = vmul.f32 0.03125, %v2150_v52 }
 0xb5c   : > { %v2152_v54 = vsub.f32 %v2147_v50, %v2151_v53 }
 0xb5e   : > { %v2153_v55 = vmul.f32 %v2152_v54, %v2152_v54 }
 0xb60   : > { %v2154_v56 = vsel %vm1210_vm8, %v2153_v55, 0.0 }
 0xb61   : > { %2155 = vadd.xlane.f32.xlu0 %v2154_v56 }
 0xbee   : > { %v2156_v57 = vpop.xlane.xlu0 %2155 }
 0xbef   : > { %v2157_v58 = vmul.f32 0.03125, %v2156_v57 }
 0xbf1   : > { %v2158_v59 = vadd.f32 1e-05, %v2157_v58 }
 0xbf3   : > { %2887 = vrsqrt.f32 %v2158_v59 }
 0xbfd   : > { %v2888_v60 = vpop.eup %2887 }
 0xbfe   : > { %v2160_v61 = vmul.f32 %v2888_v60, %v2152_v54 }
 0xc00   : > { %v2161_v62 = vmul.f32 %v2547_v28, %v2160_v61 }
 0xc02   : > { %v2162_v63 = vadd.f32 %v2548_v29, %v2161_v62 }
 0xc04   : > { %2163 = vst.msk [vmem:[%s3654_s18] sm:$0xff] %vm1210_vm8, %v2162_v63 }
 0xc05   : > { %3050 = shalt.err (!%p3047_p2)
}
 0xc06   : > { %s3051_s18 = scalar_lea.hbm %s3855_s19, 128  ;;  %s3055_s7 = scalar_lea.hbm %s4060_s6, 256 }
 0xc07   : > { %p3052_p1 = scmp.ne.s32.totalorder %s3855_s19, %s3051_s18  ;;  %p3056_p11 = scmp.lt.u32.totalorder %s3855_s19, %s4060_s6 }
 0xc08   : > { %p3057_p3 = scmp.lt.u32.totalorder %s3055_s7, %s3051_s18  ;;  %p3059_p13 = scmp.lt.u32.totalorder %s3051_s18, %s3855_s19 }
 0xc09   : > { %p3053_p12 = pnand %p3052_p1, %p4061_p7 }
 0xc0a   : > { %p3058_p5 = por %p3057_p3, %p3056_p11 }
 0xc0b   : > { %p3054_p4 = pneg %p3053_p12 }
 0xc0c   : > { %p3060_p0 = por %p3059_p13, %p3058_p5 }
 0xc0e   : > { %p3061_p9 = pnand %p3060_p0, %p3054_p4 }
 0xc10   : > { %3064 = shalt.err (!%p3061_p9)
}
 0xc11   : > { %2740 = dma.vmem_to_hbm [thread:$0]  (%p4061_p7), %s3857_s10, 128, %s3855_s19, %s2165_s5  }
 0xc12 PF: > { %s4062_s23 = sld [smem:[#allocation23_spill]]  ;;  %s4063_s29 = sld [smem:[#allocation17_spill]] }
 0xc13   : > { %s4064_s14 = sld [smem:[#allocation25_spill]] }
 0xc18   : > { %p2766_p8 = scmp.ge.s32.totalorder %s4062_s23, 2  ;;  %s2190_s13 = sand.u32 1, %s4063_s29  }
 0xc19   : > { %p4065_p6 = scmp.ne.s32.totalorder %s4064_s14, 0  ;;  %s2191_s9 = scalar_lea.sflag [#allocation4], %s2190_s13 }
 0xc1b   : > { %p2760_p10 = pnand %p2766_p8, %p4065_p6 }
 0xc1d   : > { %3114 = dma.done.wait (!%p2760_p10), %s2191_s9, 128  }
 0xc1e   : > { %3116 = vsyncadd (!%p2760_p10), %s2191_s9, 4294967168  ;;  %s43_s0 = sadd.s32 1, %s4062_s23   ;;  %s4066_s2 = sld [smem:[#allocation18_spill]] }
 0xc1f   : > { %p40_p2 = scmp.ge.s32.totalorder %s43_s0, 6   ;;  %s4067_s25 = sld [smem:[#allocation19_spill]] }
 0xc20   : > { %s4068_s26 = sld [smem:[#allocation28_spill]]  ;;  %s4069_s27 = sld [smem:[#allocation21_spill]] }
 0xc21   : > { %s4070_s3 = sld [smem:[#allocation22_spill]]  ;;  %s4071_s28 = sld [smem:[#allocation26_spill]] }
 0xc22   : > { %s4072_s29 = sld [smem:[#allocation27_spill]]  ;;  %42 = sbr.rel (!%p40_p2) target bundleno = 33 (0x21), region = 239 }
 0xc29   :  { %2196 = vsyncpa [#allocation3], 1 }
 0xc2a   :  { %2198 = vsyncpa [#allocation3 + $0x1], 1 }
 0xc2b   :  { %2199 = vsyncpa [#allocation6], 1 }
 0xc2c   :  { %2201 = vsyncpa [#allocation6 + $0x1], 1 }
 0xc2d   :  { %2202 = vsyncpa [#allocation9], 1 }
 0xc2e   :  { %2204 = vsyncpa [#allocation9 + $0x1], 1 }
 0xc2f   :  { %2205 = vsyncpa [#allocation4], 1 }
 0xc30   :  { %2207 = vsyncpa [#allocation4 + $0x1], 1 }

</bundles_post_ra>
